<compile_context>
chip_gen: v6e
topology: v6e:2x2x1
jax: 0.10.0
libtpu: 0.0.40
codegen_flags: <defaults>
</compile_context>

<pallas_src>
import jax
import jax.numpy as jnp
from jax import lax
from jax.experimental import pallas as pl
from jax.experimental.pallas import tpu as pltpu

LANE = 128
SUBLANE = 8


def _round_up(x, m):
    return (x + m - 1) // m * m


def nextchar_kernel(tokens_ref, emb_ref, w1_ref, b1_ref, w2_ref, b2_ref,
                    w3_ref, b3_ref, w4_ref, b4_ref, o_ref):
    """Fused embedding lookup + 4-layer sin-MLP.

    tokens_ref: (Bp, T)    int32
    emb_ref:    (V, E)     f32
    w1_ref:     (T*E, Hp)  f32   b1_ref: (1, Hp)
    w2_ref:     (Hp, Hp)   f32   b2_ref: (1, Hp)
    w3_ref:     (Hp, Hp)   f32   b3_ref: (1, Hp)
    w4_ref:     (Hp, Vp)   f32   b4_ref: (1, Vp)
    o_ref:      (Bp, Vp)   f32   (lane-dense: Hp, Vp are multiples of 128)
    """
    Bp, T = tokens_ref.shape
    V, E = emb_ref.shape
    Hp = w1_ref.shape[1]

    tokens = tokens_ref[...]                                   # (Bp, T) int32
    vocab_iota = lax.broadcasted_iota(jnp.int32, (Bp, V), 1)   # (Bp, V)

    # Fused embedding gather + lin1.  For each token position p:
    #   onehot(tok_p) @ emb           == emb[tok_p]            (exact gather)
    #   emb[tok_p]    @ w1[p*E:(p+1)*E]                        (its slice of lin1)
    # accumulated over positions.  Static unrolled loop (T is small).
    z1 = jnp.zeros((Bp, Hp), jnp.float32)
    for p in range(T):
        onehot = (tokens[:, p:p + 1] == vocab_iota).astype(jnp.float32)        # (Bp, V)
        e_p = jnp.dot(onehot, emb_ref[...],
                      preferred_element_type=jnp.float32)                      # (Bp, E)
        z1 = z1 + jnp.dot(e_p, w1_ref[p * E:(p + 1) * E, :],
                          preferred_element_type=jnp.float32)                  # (Bp, Hp)

    h = jnp.sin(z1 + b1_ref[...])
    h = jnp.sin(jnp.dot(h, w2_ref[...], preferred_element_type=jnp.float32) + b2_ref[...])
    h = jnp.sin(jnp.dot(h, w3_ref[...], preferred_element_type=jnp.float32) + b3_ref[...])
    o_ref[...] = (jnp.dot(h, w4_ref[...], preferred_element_type=jnp.float32)
                  + b4_ref[...]).astype(o_ref.dtype)


def pad_params_for_tpu(params):
    """One-time parameter prep: zero-pad hidden and output-vocab feature dims
    up to a multiple of 128 so every matmul output / store is lane-dense.
    Zero padding is exactly inert (sin(0) == 0)."""
    H = params["w1"].shape[1]
    Vout = params["w4"].shape[1]
    Hp = _round_up(H, LANE)
    Vp = _round_up(Vout, LANE)

    def pad2(a, rows, cols):
        return jnp.pad(a, ((0, rows - a.shape[0]), (0, cols - a.shape[1])))

    in1 = params["w1"].shape[0]
    return dict(
        emb=params["emb"],
        w1=pad2(params["w1"], in1, Hp), b1=pad2(params["b1"], 1, Hp),
        w2=pad2(params["w2"], Hp, Hp),  b2=pad2(params["b2"], 1, Hp),
        w3=pad2(params["w3"], Hp, Hp),  b3=pad2(params["b3"], 1, Hp),
        w4=pad2(params["w4"], Hp, Vp),  b4=pad2(params["b4"], 1, Vp),
    )


def nextchar_forward(tokens, kparams, vocab_size):
    """tokens: (B, block_size) int32.  kparams: output of pad_params_for_tpu.
    Returns logits (B, vocab_size) f32."""
    B, _ = tokens.shape
    Bp = max(SUBLANE, _round_up(B, SUBLANE))
    if Bp != B:
        tokens = jnp.pad(tokens, ((0, Bp - B), (0, 0)))
    Vp = kparams["w4"].shape[1]

    out = pl.pallas_call(
        nextchar_kernel,
        out_shape=jax.ShapeDtypeStruct((Bp, Vp), jnp.float32),
    )(tokens, kparams["emb"],
      kparams["w1"], kparams["b1"],
      kparams["w2"], kparams["b2"],
      kparams["w3"], kparams["b3"],
      kparams["w4"], kparams["b4"])

    # TODO(synk): for an autoregressive decode loop, amortize launches by
    # adding a steps grid axis with constant index_maps for the weights.
    return out[:B, :vocab_size]


def init_params(key, block_size, vocab_size, emb_dim, hidden_size):
    """Deterministic synthetic init.  Weights stored as (in, out) = PyTorch W^T."""
    ks = jax.random.split(key, 9)
    in1 = block_size * emb_dim

    def lin(kw, kb, fan_in, fan_out):
        bound = 1.0 / jnp.sqrt(fan_in)
        w = jax.random.uniform(kw, (fan_in, fan_out), jnp.float32, -bound, bound)
        b = jax.random.uniform(kb, (1, fan_out), jnp.float32, -bound, bound)
        return w, b

    emb = jax.random.normal(ks[0], (vocab_size, emb_dim), jnp.float32)
    w1, b1 = lin(ks[1], ks[2], in1, hidden_size)
    w2, b2 = lin(ks[3], ks[4], hidden_size, hidden_size)
    w3, b3 = lin(ks[5], ks[6], hidden_size, hidden_size)
    w4, b4 = lin(ks[7], ks[8], hidden_size, vocab_size)
    return dict(emb=emb, w1=w1, b1=b1, w2=w2, b2=b2,
                w3=w3, b3=b3, w4=w4, b4=b4)


def reference_forward(tokens, params):
    """Pure-JAX reference matching the PyTorch forward (unpadded params)."""
    x = jnp.take(params["emb"], tokens, axis=0).reshape(tokens.shape[0], -1)
    x = jnp.sin(x @ params["w1"] + params["b1"])
    x = jnp.sin(x @ params["w2"] + params["b2"])
    x = jnp.sin(x @ params["w3"] + params["b3"])
    return x @ params["w4"] + params["b4"]


if __name__ == "__main__":
    block_size = 8
    vocab_size = 32
    emb_dim = 16
    hidden_size = 32
    batch = 8

    key = jax.random.PRNGKey(0)
    k_params, k_tokens = jax.random.split(key)
    params = init_params(k_params, block_size, vocab_size, emb_dim, hidden_size)
    kparams = pad_params_for_tpu(params)          # one-time lane-dense padding
    tokens = jax.random.randint(k_tokens, (batch, block_size), 0, vocab_size,
                                dtype=jnp.int32)

    logits = nextchar_forward(tokens, kparams, vocab_size)
    logits = jax.block_until_ready(logits)

    ref = jax.block_until_ready(reference_forward(tokens, params))
    assert logits.shape == (batch, vocab_size)
    assert jnp.allclose(logits, ref, atol=1e-5, rtol=1e-5)

    print("KERNEL_OK")
</pallas_src>

<mosaic_0001>
module attributes {stable_mosaic.version = 11 : i64} {
  func.func @nextchar_kernel(%arg0: memref<8x8xi32, #tpu.memory_space<vmem>>, %arg1: memref<32x16xf32, #tpu.memory_space<vmem>>, %arg2: memref<128x128xf32, #tpu.memory_space<vmem>>, %arg3: memref<1x128xf32, #tpu.memory_space<vmem>>, %arg4: memref<128x128xf32, #tpu.memory_space<vmem>>, %arg5: memref<1x128xf32, #tpu.memory_space<vmem>>, %arg6: memref<128x128xf32, #tpu.memory_space<vmem>>, %arg7: memref<1x128xf32, #tpu.memory_space<vmem>>, %arg8: memref<128x128xf32, #tpu.memory_space<vmem>>, %arg9: memref<1x128xf32, #tpu.memory_space<vmem>>, %arg10: memref<8x128xf32, #tpu.memory_space<vmem>>) attributes {dimension_semantics = [], scalar_prefetch = 0 : i64, scratch_operands = 0 : i64, tpu.core_type = #tpu.core_type<tc>} {
    %c0 = arith.constant 0 : index
    %c0_0 = arith.constant 0 : index
    %0 = vector.load %arg0[%c0, %c0_0] : memref<8x8xi32, #tpu.memory_space<vmem>>, vector<8x8xi32>
    %1 = tpu.iota {dimensions = array<i32: 1>} : vector<8x32xi32>
    %cst = arith.constant 0.000000e+00 : f32
    %2 = vector.broadcast %cst : f32 to vector<8x128xf32>
    %3 = vector.extract_strided_slice %0 {offsets = [0, 0], sizes = [8, 1], strides = [1, 1]} : vector<8x8xi32> to vector<8x1xi32>
    %4 = vector.broadcast %3 : vector<8x1xi32> to vector<8x32xi32>
    %5 = arith.cmpi eq, %4, %1 : vector<8x32xi32>
    %6 = arith.extui %5 : vector<8x32xi1> to vector<8x32xi32>
    %7 = arith.sitofp %6 : vector<8x32xi32> to vector<8x32xf32>
    %c0_1 = arith.constant 0 : index
    %c0_2 = arith.constant 0 : index
    %8 = vector.load %arg1[%c0_1, %c0_2] : memref<32x16xf32, #tpu.memory_space<vmem>>, vector<32x16xf32>
    %cst_3 = arith.constant dense<0.000000e+00> : vector<8x16xf32>
    %9 = tpu.matmul %7, %8, %cst_3 {dimension_numbers = #tpu.dot_dimension_numbers<[1], [0], [0], [1], [0, 0, 1, 1], [], []>} : vector<8x32xf32>, vector<32x16xf32>, vector<8x16xf32> -> vector<8x16xf32>
    %c0_4 = arith.constant 0 : index
    %c0_5 = arith.constant 0 : index
    %10 = vector.load %arg2[%c0_4, %c0_5] : memref<128x128xf32, #tpu.memory_space<vmem>>, vector<16x128xf32>
    %cst_6 = arith.constant dense<0.000000e+00> : vector<8x128xf32>
    %11 = tpu.matmul %9, %10, %cst_6 {dimension_numbers = #tpu.dot_dimension_numbers<[1], [0], [0], [1], [0, 0, 1, 1], [], []>} : vector<8x16xf32>, vector<16x128xf32>, vector<8x128xf32> -> vector<8x128xf32>
    %12 = arith.addf %2, %11 : vector<8x128xf32>
    %13 = vector.extract_strided_slice %0 {offsets = [0, 1], sizes = [8, 1], strides = [1, 1]} : vector<8x8xi32> to vector<8x1xi32>
    %14 = vector.broadcast %13 : vector<8x1xi32> to vector<8x32xi32>
    %15 = arith.cmpi eq, %14, %1 : vector<8x32xi32>
    %16 = arith.extui %15 : vector<8x32xi1> to vector<8x32xi32>
    %17 = arith.sitofp %16 : vector<8x32xi32> to vector<8x32xf32>
    %c0_7 = arith.constant 0 : index
    %c0_8 = arith.constant 0 : index
    %18 = vector.load %arg1[%c0_7, %c0_8] : memref<32x16xf32, #tpu.memory_space<vmem>>, vector<32x16xf32>
    %cst_9 = arith.constant dense<0.000000e+00> : vector<8x16xf32>
    %19 = tpu.matmul %17, %18, %cst_9 {dimension_numbers = #tpu.dot_dimension_numbers<[1], [0], [0], [1], [0, 0, 1, 1], [], []>} : vector<8x32xf32>, vector<32x16xf32>, vector<8x16xf32> -> vector<8x16xf32>
    %c16 = arith.constant 16 : index
    %c0_10 = arith.constant 0 : index
    %20 = vector.load %arg2[%c16, %c0_10] : memref<128x128xf32, #tpu.memory_space<vmem>>, vector<16x128xf32>
    %cst_11 = arith.constant dense<0.000000e+00> : vector<8x128xf32>
    %21 = tpu.matmul %19, %20, %cst_11 {dimension_numbers = #tpu.dot_dimension_numbers<[1], [0], [0], [1], [0, 0, 1, 1], [], []>} : vector<8x16xf32>, vector<16x128xf32>, vector<8x128xf32> -> vector<8x128xf32>
    %22 = arith.addf %12, %21 : vector<8x128xf32>
    %23 = vector.extract_strided_slice %0 {offsets = [0, 2], sizes = [8, 1], strides = [1, 1]} : vector<8x8xi32> to vector<8x1xi32>
    %24 = vector.broadcast %23 : vector<8x1xi32> to vector<8x32xi32>
    %25 = arith.cmpi eq, %24, %1 : vector<8x32xi32>
    %26 = arith.extui %25 : vector<8x32xi1> to vector<8x32xi32>
    %27 = arith.sitofp %26 : vector<8x32xi32> to vector<8x32xf32>
    %c0_12 = arith.constant 0 : index
    %c0_13 = arith.constant 0 : index
    %28 = vector.load %arg1[%c0_12, %c0_13] : memref<32x16xf32, #tpu.memory_space<vmem>>, vector<32x16xf32>
    %cst_14 = arith.constant dense<0.000000e+00> : vector<8x16xf32>
    %29 = tpu.matmul %27, %28, %cst_14 {dimension_numbers = #tpu.dot_dimension_numbers<[1], [0], [0], [1], [0, 0, 1, 1], [], []>} : vector<8x32xf32>, vector<32x16xf32>, vector<8x16xf32> -> vector<8x16xf32>
    %c32 = arith.constant 32 : index
    %c0_15 = arith.constant 0 : index
    %30 = vector.load %arg2[%c32, %c0_15] : memref<128x128xf32, #tpu.memory_space<vmem>>, vector<16x128xf32>
    %cst_16 = arith.constant dense<0.000000e+00> : vector<8x128xf32>
    %31 = tpu.matmul %29, %30, %cst_16 {dimension_numbers = #tpu.dot_dimension_numbers<[1], [0], [0], [1], [0, 0, 1, 1], [], []>} : vector<8x16xf32>, vector<16x128xf32>, vector<8x128xf32> -> vector<8x128xf32>
    %32 = arith.addf %22, %31 : vector<8x128xf32>
    %33 = vector.extract_strided_slice %0 {offsets = [0, 3], sizes = [8, 1], strides = [1, 1]} : vector<8x8xi32> to vector<8x1xi32>
    %34 = vector.broadcast %33 : vector<8x1xi32> to vector<8x32xi32>
    %35 = arith.cmpi eq, %34, %1 : vector<8x32xi32>
    %36 = arith.extui %35 : vector<8x32xi1> to vector<8x32xi32>
    %37 = arith.sitofp %36 : vector<8x32xi32> to vector<8x32xf32>
    %c0_17 = arith.constant 0 : index
    %c0_18 = arith.constant 0 : index
    %38 = vector.load %arg1[%c0_17, %c0_18] : memref<32x16xf32, #tpu.memory_space<vmem>>, vector<32x16xf32>
    %cst_19 = arith.constant dense<0.000000e+00> : vector<8x16xf32>
    %39 = tpu.matmul %37, %38, %cst_19 {dimension_numbers = #tpu.dot_dimension_numbers<[1], [0], [0], [1], [0, 0, 1, 1], [], []>} : vector<8x32xf32>, vector<32x16xf32>, vector<8x16xf32> -> vector<8x16xf32>
    %c48 = arith.constant 48 : index
    %c0_20 = arith.constant 0 : index
    %40 = vector.load %arg2[%c48, %c0_20] : memref<128x128xf32, #tpu.memory_space<vmem>>, vector<16x128xf32>
    %cst_21 = arith.constant dense<0.000000e+00> : vector<8x128xf32>
    %41 = tpu.matmul %39, %40, %cst_21 {dimension_numbers = #tpu.dot_dimension_numbers<[1], [0], [0], [1], [0, 0, 1, 1], [], []>} : vector<8x16xf32>, vector<16x128xf32>, vector<8x128xf32> -> vector<8x128xf32>
    %42 = arith.addf %32, %41 : vector<8x128xf32>
    %43 = vector.extract_strided_slice %0 {offsets = [0, 4], sizes = [8, 1], strides = [1, 1]} : vector<8x8xi32> to vector<8x1xi32>
    %44 = vector.broadcast %43 : vector<8x1xi32> to vector<8x32xi32>
    %45 = arith.cmpi eq, %44, %1 : vector<8x32xi32>
    %46 = arith.extui %45 : vector<8x32xi1> to vector<8x32xi32>
    %47 = arith.sitofp %46 : vector<8x32xi32> to vector<8x32xf32>
    %c0_22 = arith.constant 0 : index
    %c0_23 = arith.constant 0 : index
    %48 = vector.load %arg1[%c0_22, %c0_23] : memref<32x16xf32, #tpu.memory_space<vmem>>, vector<32x16xf32>
    %cst_24 = arith.constant dense<0.000000e+00> : vector<8x16xf32>
    %49 = tpu.matmul %47, %48, %cst_24 {dimension_numbers = #tpu.dot_dimension_numbers<[1], [0], [0], [1], [0, 0, 1, 1], [], []>} : vector<8x32xf32>, vector<32x16xf32>, vector<8x16xf32> -> vector<8x16xf32>
    %c64 = arith.constant 64 : index
    %c0_25 = arith.constant 0 : index
    %50 = vector.load %arg2[%c64, %c0_25] : memref<128x128xf32, #tpu.memory_space<vmem>>, vector<16x128xf32>
    %cst_26 = arith.constant dense<0.000000e+00> : vector<8x128xf32>
    %51 = tpu.matmul %49, %50, %cst_26 {dimension_numbers = #tpu.dot_dimension_numbers<[1], [0], [0], [1], [0, 0, 1, 1], [], []>} : vector<8x16xf32>, vector<16x128xf32>, vector<8x128xf32> -> vector<8x128xf32>
    %52 = arith.addf %42, %51 : vector<8x128xf32>
    %53 = vector.extract_strided_slice %0 {offsets = [0, 5], sizes = [8, 1], strides = [1, 1]} : vector<8x8xi32> to vector<8x1xi32>
    %54 = vector.broadcast %53 : vector<8x1xi32> to vector<8x32xi32>
    %55 = arith.cmpi eq, %54, %1 : vector<8x32xi32>
    %56 = arith.extui %55 : vector<8x32xi1> to vector<8x32xi32>
    %57 = arith.sitofp %56 : vector<8x32xi32> to vector<8x32xf32>
    %c0_27 = arith.constant 0 : index
    %c0_28 = arith.constant 0 : index
    %58 = vector.load %arg1[%c0_27, %c0_28] : memref<32x16xf32, #tpu.memory_space<vmem>>, vector<32x16xf32>
    %cst_29 = arith.constant dense<0.000000e+00> : vector<8x16xf32>
    %59 = tpu.matmul %57, %58, %cst_29 {dimension_numbers = #tpu.dot_dimension_numbers<[1], [0], [0], [1], [0, 0, 1, 1], [], []>} : vector<8x32xf32>, vector<32x16xf32>, vector<8x16xf32> -> vector<8x16xf32>
    %c80 = arith.constant 80 : index
    %c0_30 = arith.constant 0 : index
    %60 = vector.load %arg2[%c80, %c0_30] : memref<128x128xf32, #tpu.memory_space<vmem>>, vector<16x128xf32>
    %cst_31 = arith.constant dense<0.000000e+00> : vector<8x128xf32>
    %61 = tpu.matmul %59, %60, %cst_31 {dimension_numbers = #tpu.dot_dimension_numbers<[1], [0], [0], [1], [0, 0, 1, 1], [], []>} : vector<8x16xf32>, vector<16x128xf32>, vector<8x128xf32> -> vector<8x128xf32>
    %62 = arith.addf %52, %61 : vector<8x128xf32>
    %63 = vector.extract_strided_slice %0 {offsets = [0, 6], sizes = [8, 1], strides = [1, 1]} : vector<8x8xi32> to vector<8x1xi32>
    %64 = vector.broadcast %63 : vector<8x1xi32> to vector<8x32xi32>
    %65 = arith.cmpi eq, %64, %1 : vector<8x32xi32>
    %66 = arith.extui %65 : vector<8x32xi1> to vector<8x32xi32>
    %67 = arith.sitofp %66 : vector<8x32xi32> to vector<8x32xf32>
    %c0_32 = arith.constant 0 : index
    %c0_33 = arith.constant 0 : index
    %68 = vector.load %arg1[%c0_32, %c0_33] : memref<32x16xf32, #tpu.memory_space<vmem>>, vector<32x16xf32>
    %cst_34 = arith.constant dense<0.000000e+00> : vector<8x16xf32>
    %69 = tpu.matmul %67, %68, %cst_34 {dimension_numbers = #tpu.dot_dimension_numbers<[1], [0], [0], [1], [0, 0, 1, 1], [], []>} : vector<8x32xf32>, vector<32x16xf32>, vector<8x16xf32> -> vector<8x16xf32>
    %c96 = arith.constant 96 : index
    %c0_35 = arith.constant 0 : index
    %70 = vector.load %arg2[%c96, %c0_35] : memref<128x128xf32, #tpu.memory_space<vmem>>, vector<16x128xf32>
    %cst_36 = arith.constant dense<0.000000e+00> : vector<8x128xf32>
    %71 = tpu.matmul %69, %70, %cst_36 {dimension_numbers = #tpu.dot_dimension_numbers<[1], [0], [0], [1], [0, 0, 1, 1], [], []>} : vector<8x16xf32>, vector<16x128xf32>, vector<8x128xf32> -> vector<8x128xf32>
    %72 = arith.addf %62, %71 : vector<8x128xf32>
    %73 = vector.extract_strided_slice %0 {offsets = [0, 7], sizes = [8, 1], strides = [1, 1]} : vector<8x8xi32> to vector<8x1xi32>
    %74 = vector.broadcast %73 : vector<8x1xi32> to vector<8x32xi32>
    %75 = arith.cmpi eq, %74, %1 : vector<8x32xi32>
    %76 = arith.extui %75 : vector<8x32xi1> to vector<8x32xi32>
    %77 = arith.sitofp %76 : vector<8x32xi32> to vector<8x32xf32>
    %c0_37 = arith.constant 0 : index
    %c0_38 = arith.constant 0 : index
    %78 = vector.load %arg1[%c0_37, %c0_38] : memref<32x16xf32, #tpu.memory_space<vmem>>, vector<32x16xf32>
    %cst_39 = arith.constant dense<0.000000e+00> : vector<8x16xf32>
    %79 = tpu.matmul %77, %78, %cst_39 {dimension_numbers = #tpu.dot_dimension_numbers<[1], [0], [0], [1], [0, 0, 1, 1], [], []>} : vector<8x32xf32>, vector<32x16xf32>, vector<8x16xf32> -> vector<8x16xf32>
    %c112 = arith.constant 112 : index
    %c0_40 = arith.constant 0 : index
    %80 = vector.load %arg2[%c112, %c0_40] : memref<128x128xf32, #tpu.memory_space<vmem>>, vector<16x128xf32>
    %cst_41 = arith.constant dense<0.000000e+00> : vector<8x128xf32>
    %81 = tpu.matmul %79, %80, %cst_41 {dimension_numbers = #tpu.dot_dimension_numbers<[1], [0], [0], [1], [0, 0, 1, 1], [], []>} : vector<8x16xf32>, vector<16x128xf32>, vector<8x128xf32> -> vector<8x128xf32>
    %82 = arith.addf %72, %81 : vector<8x128xf32>
    %c0_42 = arith.constant 0 : index
    %c0_43 = arith.constant 0 : index
    %83 = vector.load %arg3[%c0_42, %c0_43] : memref<1x128xf32, #tpu.memory_space<vmem>>, vector<1x128xf32>
    %84 = vector.broadcast %83 : vector<1x128xf32> to vector<8x128xf32>
    %85 = arith.addf %82, %84 : vector<8x128xf32>
    %86 = math.sin %85 : vector<8x128xf32>
    %c0_44 = arith.constant 0 : index
    %c0_45 = arith.constant 0 : index
    %87 = vector.load %arg4[%c0_44, %c0_45] : memref<128x128xf32, #tpu.memory_space<vmem>>, vector<128x128xf32>
    %cst_46 = arith.constant dense<0.000000e+00> : vector<8x128xf32>
    %88 = tpu.matmul %86, %87, %cst_46 {dimension_numbers = #tpu.dot_dimension_numbers<[1], [0], [0], [1], [0, 0, 1, 1], [], []>} : vector<8x128xf32>, vector<128x128xf32>, vector<8x128xf32> -> vector<8x128xf32>
    %c0_47 = arith.constant 0 : index
    %c0_48 = arith.constant 0 : index
    %89 = vector.load %arg5[%c0_47, %c0_48] : memref<1x128xf32, #tpu.memory_space<vmem>>, vector<1x128xf32>
    %90 = vector.broadcast %89 : vector<1x128xf32> to vector<8x128xf32>
    %91 = arith.addf %88, %90 : vector<8x128xf32>
    %92 = math.sin %91 : vector<8x128xf32>
    %c0_49 = arith.constant 0 : index
    %c0_50 = arith.constant 0 : index
    %93 = vector.load %arg6[%c0_49, %c0_50] : memref<128x128xf32, #tpu.memory_space<vmem>>, vector<128x128xf32>
    %cst_51 = arith.constant dense<0.000000e+00> : vector<8x128xf32>
    %94 = tpu.matmul %92, %93, %cst_51 {dimension_numbers = #tpu.dot_dimension_numbers<[1], [0], [0], [1], [0, 0, 1, 1], [], []>} : vector<8x128xf32>, vector<128x128xf32>, vector<8x128xf32> -> vector<8x128xf32>
    %c0_52 = arith.constant 0 : index
    %c0_53 = arith.constant 0 : index
    %95 = vector.load %arg7[%c0_52, %c0_53] : memref<1x128xf32, #tpu.memory_space<vmem>>, vector<1x128xf32>
    %96 = vector.broadcast %95 : vector<1x128xf32> to vector<8x128xf32>
    %97 = arith.addf %94, %96 : vector<8x128xf32>
    %98 = math.sin %97 : vector<8x128xf32>
    %c0_54 = arith.constant 0 : index
    %c0_55 = arith.constant 0 : index
    %99 = vector.load %arg8[%c0_54, %c0_55] : memref<128x128xf32, #tpu.memory_space<vmem>>, vector<128x128xf32>
    %cst_56 = arith.constant dense<0.000000e+00> : vector<8x128xf32>
    %100 = tpu.matmul %98, %99, %cst_56 {dimension_numbers = #tpu.dot_dimension_numbers<[1], [0], [0], [1], [0, 0, 1, 1], [], []>} : vector<8x128xf32>, vector<128x128xf32>, vector<8x128xf32> -> vector<8x128xf32>
    %c0_57 = arith.constant 0 : index
    %c0_58 = arith.constant 0 : index
    %101 = vector.load %arg9[%c0_57, %c0_58] : memref<1x128xf32, #tpu.memory_space<vmem>>, vector<1x128xf32>
    %102 = vector.broadcast %101 : vector<1x128xf32> to vector<8x128xf32>
    %103 = arith.addf %100, %102 : vector<8x128xf32>
    %c0_59 = arith.constant 0 : index
    %c0_60 = arith.constant 0 : index
    %104 = vector.load %arg10[%c0_59, %c0_60] : memref<8x128xf32, #tpu.memory_space<vmem>>, vector<8x128xf32>
    tpu.vector_store %arg10[%c0_59, %c0_60], %103 {strides = array<i32>} : memref<8x128xf32, #tpu.memory_space<vmem>>, vector<8x128xf32>,
    return
  }
}

</mosaic_0001>

<bundles_post_ra>
// kernel: tpu_custom_call.1
= control target key start
LH: loop header
LB: loop body
LE: loop exit
PB: predicated region body
PF: predicated region fallthrough
CT: control target
= control target key end

     0   :  { %15 = vsyncpa [#allocation3], 0  ;;  %s2969_s0 = inlined_call_operand.vmem [shape: s32[8,8], index: 0, kind: input, shape index: {}]   ;;  %s2970_s1 = inlined_call_operand.vmem [shape: f32[32,16], index: 1, kind: input, shape index: {}]   ;;  %s2971_s2 = inlined_call_operand.hbm [shape: f32[128,128], index: 2, kind: input, shape index: {}]   ;;  %s2972_s3 = inlined_call_operand.vmem [shape: f32[1,128], index: 3, kind: input, shape index: {}]   ;;  %s2973_s4 = inlined_call_operand.hbm [shape: f32[128,128], index: 4, kind: input, shape index: {}]   ;;  %s2974_s5 = inlined_call_operand.vmem [shape: f32[1,128], index: 5, kind: input, shape index: {}]   ;;  %s2975_s6 = inlined_call_operand.hbm [shape: f32[128,128], index: 6, kind: input, shape index: {}]   ;;  %s2976_s7 = inlined_call_operand.vmem [shape: f32[1,128], index: 7, kind: input, shape index: {}]   ;;  %s2977_s8 = inlined_call_operand.hbm [shape: f32[128,128], index: 8, kind: input, shape index: {}]   ;;  %s2978_s9 = inlined_call_operand.vmem [shape: f32[1,128], index: 9, kind: input, shape index: {}]   ;;  %s2979_s10 = inlined_call_operand.hbm [shape: f32[8,128], index: 10, kind: output, shape index: {}]  }
   0x1   :  { %16 = vsyncpa [#allocation6], 0 }
   0x2   :  { %17 = vsyncpa [#allocation9], 0 }
   0x3   :  { %18 = vsyncpa [#allocation4], 0  ;;  %s2523_s13 = smov [#allocation5]   ;;  %s2524_s15 = smov [#allocation2]  }
   0x4   :  { %s42_s14 = sshll.u32 %s2523_s13, 4  ;;  %s28_s16 = sshll.u32 %s2524_s15, 4  ;;  %s43_s14 = int_to_ptr.vmem [resolvable:$true] %s42_s14  ;;  %s29_s16 = int_to_ptr.vmem [resolvable:$true] %s28_s16 }
   0x5   :  { %s2423_s17 = scalar_lea.vmem %s43_s14, 2048  ;;  %p2428_p1 = scmp.lt.s32.totalorder %s43_s14, %s43_s14 }
   0x6   :  { %p2424_p0 = scmp.ne.s32.totalorder %s43_s14, %s2423_s17  ;;  %p2429_p2 = scmp.lt.s32.totalorder %s2423_s17, %s2423_s17 }
   0x8   :  { %p2430_p3 = por %p2429_p2, %p2428_p1 }
   0xa   :  { %p2431_p4 = pnand %p2430_p3, %p2424_p0 }
   0xc   :  { %2434 = shalt.err (!%p2431_p4)
}
   0xd   :  { %s2525_s18 = smov 128   ;;  %s2526_s19 = smov 8  }
   0xe   :  { %48 = dma.hbm_to_vmem [thread:$0]  %s2973_s4, 2048, %s43_s14, [#allocation6], %s2525_s18, %s2525_s18, %s2526_s19  }
   0xf   :  { %s2443_s22 = scalar_lea.vmem %s29_s16, 2048  ;;  %p2448_p6 = scmp.lt.s32.totalorder %s29_s16, %s29_s16 }
  0x10   :  { %p2444_p5 = scmp.ne.s32.totalorder %s29_s16, %s2443_s22  ;;  %p2449_p7 = scmp.lt.s32.totalorder %s2443_s22, %s2443_s22 }
  0x12   :  { %p2450_p8 = por %p2449_p7, %p2448_p6 }
  0x14   :  { %p2451_p9 = pnand %p2450_p8, %p2444_p5 }
  0x16   :  { %2454 = shalt.err (!%p2451_p9)
}
  0x17   :  { %34 = dma.hbm_to_vmem [thread:$0]  %s2971_s2, 2048, %s29_s16, [#allocation3], %s2525_s18, %s2525_s18, %s2526_s19  }
  0x18   :  { %s2527_s25 = smov [#allocation7]   ;;  %s2528_s27 = smov [#allocation8]  }
  0x19   :  { %s56_s26 = sshll.u32 %s2527_s25, 4  ;;  %s70_s28 = sshll.u32 %s2528_s27, 4  ;;  %s57_s26 = int_to_ptr.vmem [resolvable:$true] %s56_s26  ;;  %s71_s28 = int_to_ptr.vmem [resolvable:$true] %s70_s28 }
  0x1a   :  { %s2463_s4 = scalar_lea.vmem %s57_s26, 2048  ;;  %p2468_p11 = scmp.lt.s32.totalorder %s57_s26, %s57_s26 }
  0x1b   :  { %p2464_p10 = scmp.ne.s32.totalorder %s57_s26, %s2463_s4  ;;  %p2469_p12 = scmp.lt.s32.totalorder %s2463_s4, %s2463_s4 }
  0x1d   :  { %p2470_p13 = por %p2469_p12, %p2468_p11 }
  0x1f   :  { %p2471_p0 = pnand %p2470_p13, %p2464_p10 }
  0x21   :  { %2474 = shalt.err (!%p2471_p0)
}
  0x22   :  { %62 = dma.hbm_to_vmem [thread:$0]  %s2975_s6, 2048, %s57_s26, [#allocation6], %s2525_s18, %s2525_s18, %s2526_s19  }
  0x23   :  { %s2483_s2 = scalar_lea.vmem %s71_s28, 2048  ;;  %p2488_p2 = scmp.lt.s32.totalorder %s71_s28, %s71_s28 }
  0x24   :  { %p2484_p1 = scmp.ne.s32.totalorder %s71_s28, %s2483_s2  ;;  %p2489_p3 = scmp.lt.s32.totalorder %s2483_s2, %s2483_s2 }
  0x26   :  { %p2490_p4 = por %p2489_p3, %p2488_p2 }
  0x28   :  { %p2491_p5 = pnand %p2490_p4, %p2484_p1 }
  0x2a   :  { %2494 = shalt.err (!%p2491_p5)
}
  0x2b   :  { %76 = dma.hbm_to_vmem [thread:$0]  %s2977_s8, 2048, %s71_s28, [#allocation9], %s2525_s18, %s2525_s18, %s2526_s19  }
  0x2c   :  { %2515 = dma.done.wait [#allocation3], 2048  }
  0x2d   :  { %2516 = vsyncadd [#allocation3], 4294965248 }
  0x2e   :  { %2517 = dma.done.wait [#allocation6], 4096  }
  0x2f   :  { %2518 = vsyncadd [#allocation6], 4294963200 }
  0x30   :  { %2519 = dma.done.wait [#allocation9], 2048  }
  0x31   :  { %2520 = vsyncadd [#allocation9], 4294965248  ;;  %v2529_v0 = vmov 0   ;;  %v2530_v1 = vmov 0.0   ;;  %vm2531_vm0 = vmmov 0   ;;  %v2634_v2 = vld [vmem:[%s2969_s0] sm:$0xff]  ;;  %v92_v9 = vlaneseq }
  0x32   :  { %2394 = vset.pattern.permute.xlu0 %v2529_v0  ;;  %2110 = vmatprep.subr.mxu1 %v2530_v1  ;;  %v2639_v3 = vld [vmem:[%s2970_s1 + $0x18] sm:$0xff]  ;;  %v2644_v4 = vld [vmem:[%s2970_s1 + $0x10] sm:$0xff]  ;;  %v2652_v5 = vld [vmem:[%s2970_s1 + $0x8] sm:$0xff]  ;;  %v2532_v7 = vmov 1   ;;  %v2533_v8 = vmov 2   ;;  %vm104_vm1 = vcmask 261120  }
  0x33   :  { %2132 = vmatprep.subr.mxu0 %v2530_v1  ;;  %2118 = vmatprep.mubr.msk.f32.mxu1 %vm2531_vm0, %v2530_v1  ;;  %v2659_v6 = vld [vmem:[%s2970_s1] sm:$0xff]  ;;  %v2667_v10 = vand.u32 127, %v92_v9  ;;  %v179_v15 = vld [vmem:[#allocation2 + $0x8] sm:$0xff]  ;;  %v260_v17 = vld [vmem:[#allocation2 + $0x18] sm:$0xff]  ;;  %v2534_v19 = vmov 3   ;;  %vm261_vm4 = vcmask 130048  }
  0x34   :  { %2136 = vmatprep.mubr.msk.f32.mxu0 %vm2531_vm0, %v2530_v1  ;;  %95 = vperm.xlu0 %2394, %v2634_v2   ;;  %v178_v16 = vld [vmem:[#allocation2] sm:$0xff]  ;;  %v259_v18 = vld [vmem:[#allocation2 + $0x10] sm:$0xff]  ;;  %v488_v26 = vld [vmem:[#allocation2 + $0x28] sm:$0xff]  ;;  %v2535_v28 = vmov 4   ;;  %v2536_v40 = vmov 5   ;;  %v2537_v50 = vmov 6  }
  0x35   :  { %2111 = vmatpush3.msra.mxu1 %v2639_v3  ;;  %2396 = vset.pattern.permute.xlu1 %v2533_v8  ;;  %v487_v27 = vld [vmem:[#allocation2 + $0x20] sm:$0xff]  ;;  %v643_v38 = vld [vmem:[#allocation2 + $0x38] sm:$0xff]  ;;  %v642_v39 = vld [vmem:[#allocation2 + $0x30] sm:$0xff]  ;;  %v2538_v60 = vmov 7   ;;  %s2545_s24 = smov [#allocation10]  }
  0x36   :  { %2112 = vmatprep.subr.mxu1 %v2530_v1  ;;  %409 = vperm.xlu1 %2396, %v2634_v2   ;;  %v798_v48 = vld [vmem:[#allocation2 + $0x48] sm:$0xff]  ;;  %v797_v49 = vld [vmem:[#allocation2 + $0x40] sm:$0xff]  ;;  %v953_v58 = vld [vmem:[#allocation2 + $0x58] sm:$0xff]  ;;  %s1944_s25 = sshll.u32 %s2545_s24, 4  ;;  %s1945_s25 = int_to_ptr.vmem [resolvable:$true] %s1944_s25 }
  0x37   :  { %2113 = vmatpush3.msra.mxu1 %v2644_v4  ;;  %2133 = vmatpush3.msra.mxu0 %v260_v17  ;;  %v952_v59 = vld [vmem:[#allocation2 + $0x50] sm:$0xff]  ;;  %v1108_v9 = vld [vmem:[#allocation2 + $0x68] sm:$0xff]  ;;  %s2495_s26 = scalar_lea.vmem %s1945_s25, 128  ;;  %p2500_p7 = scmp.lt.s32.totalorder %s1945_s25, %s1945_s25 }
  0x38   :  { %2114 = vmatprep.subr.mxu1 %v2530_v1  ;;  %2395 = vset.pattern.permute.xlu0 %v2532_v7  ;;  %p2496_p6 = scmp.ne.s32.totalorder %s1945_s25, %s2495_s26  ;;  %p2501_p8 = scmp.lt.s32.totalorder %s2495_s26, %s2495_s26 }
  0x39   :  { %2115 = vmatpush3.msra.mxu1 %v2652_v5  ;;  %181 = vperm.xlu0 %2395, %v2634_v2  }
  0x3a   :  { %2116 = vmatprep.subr.mxu1 %v2530_v1  ;;  %2134 = vmatprep.subr.mxu0 %v2530_v1  ;;  %p2502_p9 = por %p2501_p8, %p2500_p7 }
  0x3b   :  { %2117 = vmatpush3.msra.mxu1 %v2659_v6  ;;  %2135 = vmatpush3.msra.mxu0 %v259_v18 }
  0x3c   :  { %2121 = vmatprep.subr.mxu1 %v2530_v1  ;;  %2175 = vmatprep.subr.mxu0 %v2530_v1  ;;  %p2503_p10 = pnand %p2502_p9, %p2496_p6 }
  0x3d   :  { %2397 = vset.pattern.permute.xlu1 %v2534_v19  ;;  %2399 = vset.pattern.permute.xlu0 %v2536_v40 }
  0x3e   :  { %564 = vperm.xlu1 %2397, %v2634_v2   ;;  %874 = vperm.xlu0 %2399, %v2634_v2  }
  0x42   :  { %2398 = vset.pattern.permute.xlu1 %v2535_v28  ;;  %2402 = vset.pattern.permute.xlu0 %v2538_v60  ;;  %v1458_v28 = vld [vmem:[#allocation5 + $0x40] sm:$0xff] }
  0x43   :  { %719 = vperm.xlu1 %2398, %v2634_v2  }
  0x47   :  { %2400 = vset.pattern.permute.xlu1 %v2537_v50 }
  0x48   :  { %1029 = vperm.xlu1 %2400, %v2634_v2  }
  0x4c   :  { %2401 = vset.pattern.permute.xlu1 %v2538_v60 }
  0x4d   :  { %1184 = vperm.xlu1 %2401, %v2634_v2  }
  0xaf   :  { %v96_v11 = vpop.permute.xlu0 %95 }
  0xb0   :  { %vm97_vm2 = vcmp.eq.s32.totalorder %v96_v11, %v2667_v10  ;;  %v1107_v11 = vld [vmem:[#allocation2 + $0x60] sm:$0xff] }
  0xb1   :  { %v1955_v12 = vsel %vm97_vm2, 1.0, %v2530_v1  ;;  %v410_v21 = vpop.permute.xlu1 %409 }
  0xb2   :  { %2119 = vmatmul.mubr.msk.f32.vlgmr.msra.gmra.mxu1 %vm104_vm1, %v1955_v12  ;;  %vm411_vm5 = vcmp.eq.s32.totalorder %v410_v21, %v2667_v10  ;;  %v1465_v21 = vld [vmem:[#allocation5 + $0x78] sm:$0xff] }
  0xb3   :  { %2122 = vmatpush3.msra.mxu1 %v2639_v3  ;;  %2129 = vmatprep.mubr.msk.f32.mxu1 %vm2531_vm0, %v2530_v1  ;;  %v1961_v23 = vsel %vm411_vm5, 1.0, %v2530_v1 }
  0xb4   :  { %2123 = vmatprep.subr.mxu1 %v2530_v1  ;;  %v182_v13 = vpop.permute.xlu0 %181 }
  0xb5   :  { %2124 = vmatpush3.msra.mxu1 %v2644_v4  ;;  %vm183_vm3 = vcmp.eq.s32.totalorder %v182_v13, %v2667_v10 }
  0xb6   :  { %2125 = vmatprep.subr.mxu1 %v2530_v1  ;;  %v1957_v14 = vsel %vm183_vm3, 1.0, %v2530_v1 }
  0xb7   :  { %2126 = vmatpush3.msra.mxu1 %v2652_v5 }
  0xb8   :  { %2127 = vmatprep.subr.mxu1 %v2530_v1 }
  0xb9   :  { %2128 = vmatpush3.msra.mxu1 %v2659_v6  ;;  %v565_v31 = vpop.permute.xlu1 %564  ;;  %v875_v55 = vpop.permute.xlu0 %874 }
  0xba   :  { %2130 = vmatmul.mubr.msk.f32.vlgmr.msra.gmra.mxu1 %vm104_vm1, %v1957_v14  ;;  %2139 = vmatprep.subr.mxu1 %v2530_v1  ;;  %vm566_vm6 = vcmp.eq.s32.totalorder %v565_v31, %v2667_v10  ;;  %vm876_vm8 = vcmp.eq.s32.totalorder %v875_v55, %v2667_v10  ;;  %v1455_v31 = vld [vmem:[#allocation5 + $0x28] sm:$0xff]  ;;  %v2540_v55 = vmov 920167782  }
  0xbb   :  { %2140 = vmatpush3.msra.mxu1 %v179_v15  ;;  %2143 = vmatprep.mubr.msk.f32.mxu1 %vm2531_vm0, %v2530_v1  ;;  %v1964_v37 = vsel %vm566_vm6, 1.0, %v2530_v1  ;;  %v1970_v57 = vsel %vm876_vm8, 1.0, %v2530_v1 }
  0xbc   :  { %2141 = vmatprep.subr.mxu1 %v2530_v1 }
  0xbd   :  { %2142 = vmatpush3.msra.mxu1 %v178_v16 }
  0xbe   :  { %2146 = vmatprep.subr.mxu1 %v2530_v1  ;;  %v720_v45 = vpop.permute.xlu1 %719 }
  0xbf   :  { %vm721_vm7 = vcmp.eq.s32.totalorder %v720_v45, %v2667_v10 }
  0xc0   :  { %v1967_v47 = vsel %vm721_vm7, 1.0, %v2530_v1 }
  0xc3   :  { %v1030_v7 = vpop.permute.xlu1 %1029 }
  0xc4   :  { %vm1031_vm9 = vcmp.eq.s32.totalorder %v1030_v7, %v2667_v10 }
  0xc5   :  { %v1973_v2 = vsel %vm1031_vm9, 1.0, %v2530_v1 }
  0xc8   :  { %v1185_v16 = vpop.permute.xlu1 %1184 }
  0xc9   :  { %vm1186_vm10 = vcmp.eq.s32.totalorder %v1185_v16, %v2667_v10  ;;  %v1262_v10 = vld [vmem:[#allocation2 + $0x70] sm:$0xff] }
  0xca   :  { %v1976_v18 = vsel %vm1186_vm10, 1.0, %v2530_v1 }
 0x172   :  { %v174_v20 = vpop.f32.mrf.mxu1 }
 0x173   :  { %2144 = vmatmul.mubr.msk.f32.vlgmr.msra.gmra.mxu1 %vm261_vm4, %v174_v20 }
 0x174   :  { %2147 = vmatpush3.msra.mxu1 %v2639_v3  ;;  %v2120_v22 = vpop.f32.mrf.mxu1  ;;  %2154 = vmatprep.mubr.msk.f32.mxu1 %vm2531_vm0, %v2530_v1 }
 0x175   :  { %2148 = vmatprep.subr.mxu1 %v2530_v1  ;;  %v1464_v22 = vld [vmem:[#allocation5 + $0x70] sm:$0xff] }
 0x176   :  { %2149 = vmatpush3.msra.mxu1 %v2644_v4 }
 0x177   :  { %2150 = vmatprep.subr.mxu1 %v2530_v1 }
 0x178   :  { %2151 = vmatpush3.msra.mxu1 %v2652_v5 }
 0x179   :  { %2152 = vmatprep.subr.mxu1 %v2530_v1 }
 0x17a   :  { %v255_v24 = vpop.f32.mrf.mxu1  ;;  %2153 = vmatpush3.msra.mxu1 %v2659_v6 }
 0x17b   :  { %2137 = vmatmul.mubr.msk.f32.vlgmr.msra.gmra.mxu0 %vm261_vm4, %v255_v24  ;;  %2155 = vmatmul.mubr.msk.f32.vlgmr.msra.gmra.mxu1 %vm104_vm1, %v1961_v23  ;;  %v1463_v23 = vld [vmem:[#allocation5 + $0x68] sm:$0xff]  ;;  %v1462_v24 = vld [vmem:[#allocation5 + $0x60] sm:$0xff] }
 0x17c   :  { %v2131_v25 = vpop.f32.mrf.mxu1  ;;  %2157 = vmatprep.subr.mxu1 %v2530_v1  ;;  %2161 = vmatprep.mubr.msk.f32.mxu1 %vm2531_vm0, %v2530_v1 }
 0x17d   :  { %2179 = vmatprep.mubr.msk.f32.mxu0 %vm2531_vm0, %v2530_v1  ;;  %2158 = vmatpush3.msra.mxu1 %v488_v26  ;;  %v1461_v25 = vld [vmem:[#allocation5 + $0x58] sm:$0xff]  ;;  %v1460_v26 = vld [vmem:[#allocation5 + $0x50] sm:$0xff] }
 0x17e   :  { %2159 = vmatprep.subr.mxu1 %v2530_v1  ;;  %2176 = vmatpush3.msra.mxu0 %v643_v38  ;;  %v1979_v38 = vld [vmem:[%s2972_s3] ss:$0 sm:$0xff] }
 0x17f   :  { %2160 = vmatpush3.msra.mxu1 %v487_v27  ;;  %2177 = vmatprep.subr.mxu0 %v2530_v1  ;;  %v1459_v27 = vld [vmem:[#allocation5 + $0x48] sm:$0xff] }
 0x180   :  { %2164 = vmatprep.subr.mxu1 %v2530_v1  ;;  %2178 = vmatpush3.msra.mxu0 %v642_v39 }
 0x181   :  { %2182 = vmatprep.subr.mxu0 %v2530_v1 }
 0x233   :  { %v404_v29 = vpop.f32.mrf.mxu1 }
 0x235   :  { %v2145_v30 = vpop.f32.mrf.mxu1 }
 0x236   :  { %v1456_v30 = vld [vmem:[#allocation5 + $0x30] sm:$0xff] }
 0x23b   :  { %v331_v32 = vpop.f32.mrf.mxu0  ;;  %v483_v33 = vpop.f32.mrf.mxu1 }
 0x23c   :  { %v405_v34 = vadd.f32 %v404_v29, %v331_v32  ;;  %2162 = vmatmul.mubr.msk.f32.vlgmr.msra.gmra.mxu1 %vm261_vm4, %v483_v33  ;;  %v1457_v29 = vld [vmem:[#allocation5 + $0x38] sm:$0xff]  ;;  %v1454_v32 = vld [vmem:[#allocation5 + $0x20] sm:$0xff] }
 0x23d   :  { %2165 = vmatpush3.msra.mxu1 %v2639_v3  ;;  %v2156_v35 = vpop.f32.mrf.mxu1  ;;  %2172 = vmatprep.mubr.msk.f32.mxu1 %vm2531_vm0, %v2530_v1  ;;  %v2138_v36 = vpop.f32.mrf.mxu0  ;;  %v1453_v33 = vld [vmem:[#allocation5 + $0x18] sm:$0xff] }
 0x23e   :  { %2166 = vmatprep.subr.mxu1 %v2530_v1  ;;  %v1451_v35 = vld [vmem:[#allocation5 + $0x8] sm:$0xff]  ;;  %v1450_v36 = vld [vmem:[#allocation5] sm:$0xff] }
 0x23f   :  { %2167 = vmatpush3.msra.mxu1 %v2644_v4 }
 0x240   :  { %2168 = vmatprep.subr.mxu1 %v2530_v1 }
 0x241   :  { %2169 = vmatpush3.msra.mxu1 %v2652_v5 }
 0x242   :  { %2170 = vmatprep.subr.mxu1 %v2530_v1 }
 0x243   :  { %2171 = vmatpush3.msra.mxu1 %v2659_v6 }
 0x244   :  { %2173 = vmatmul.mubr.msk.f32.vlgmr.msra.gmra.mxu1 %vm104_vm1, %v1964_v37  ;;  %2193 = vmatprep.subr.mxu1 %v2530_v1 }
 0x245   :  { %2197 = vmatprep.mubr.msk.f32.mxu1 %vm2531_vm0, %v2530_v1  ;;  %2194 = vmatpush3.msra.mxu1 %v798_v48 }
 0x246   :  { %2195 = vmatprep.subr.mxu1 %v2530_v1 }
 0x247   :  { %2196 = vmatpush3.msra.mxu1 %v797_v49 }
 0x248   :  { %2200 = vmatprep.subr.mxu1 %v2530_v1 }
 0x2fc   :  { %v558_v41 = vpop.f32.mrf.mxu1 }
 0x2fd   :  { %v562_v42 = vadd.f32 %v558_v41, %v405_v34  ;;  %v1452_v34 = vld [vmem:[#allocation5 + $0x10] sm:$0xff] }
 0x2fe   :  { %v2163_v43 = vpop.f32.mrf.mxu1 }
 0x304   :  { %v638_v44 = vpop.f32.mrf.mxu1 }
 0x305   :  { %2180 = vmatmul.mubr.msk.f32.vlgmr.msra.gmra.mxu0 %vm261_vm4, %v638_v44 }
 0x306   :  { %2183 = vmatpush3.msra.mxu0 %v2639_v3  ;;  %v2174_v46 = vpop.f32.mrf.mxu1  ;;  %2190 = vmatprep.mubr.msk.f32.mxu0 %vm2531_vm0, %v2530_v1 }
 0x307   :  { %2184 = vmatprep.subr.mxu0 %v2530_v1 }
 0x308   :  { %2185 = vmatpush3.msra.mxu0 %v2644_v4 }
 0x309   :  { %2186 = vmatprep.subr.mxu0 %v2530_v1 }
 0x30a   :  { %2187 = vmatpush3.msra.mxu0 %v2652_v5 }
 0x30b   :  { %2188 = vmatprep.subr.mxu0 %v2530_v1 }
 0x30c   :  { %2189 = vmatpush3.msra.mxu0 %v2659_v6 }
 0x30d   :  { %2191 = vmatmul.mubr.msk.f32.vlgmr.msra.gmra.mxu0 %vm104_vm1, %v1967_v47  ;;  %2211 = vmatprep.subr.mxu0 %v2530_v1 }
 0x30e   :  { %2215 = vmatprep.mubr.msk.f32.mxu0 %vm2531_vm0, %v2530_v1  ;;  %2212 = vmatpush3.msra.mxu0 %v953_v58 }
 0x30f   :  { %2213 = vmatprep.subr.mxu0 %v2530_v1 }
 0x310   :  { %2214 = vmatpush3.msra.mxu0 %v952_v59  ;;  %v2541_v59 = vmov 1326507024  }
 0x311   :  { %2218 = vmatprep.subr.mxu0 %v2530_v1 }
 0x3c5   :  { %v713_v51 = vpop.f32.mrf.mxu0 }
 0x3c6   :  { %v717_v52 = vadd.f32 %v713_v51, %v562_v42 }
 0x3c7   :  { %v2181_v53 = vpop.f32.mrf.mxu0 }
 0x3c8   :  { %v2539_v53 = vmov 2102212464  }
 0x3cd   :  { %v793_v54 = vpop.f32.mrf.mxu0 }
 0x3ce   :  { %2198 = vmatmul.mubr.msk.f32.vlgmr.msra.gmra.mxu1 %vm261_vm4, %v793_v54 }
 0x3cf   :  { %2201 = vmatpush3.msra.mxu1 %v2639_v3  ;;  %v2192_v56 = vpop.f32.mrf.mxu0  ;;  %2208 = vmatprep.mubr.msk.f32.mxu1 %vm2531_vm0, %v2530_v1 }
 0x3d0   :  { %2202 = vmatprep.subr.mxu1 %v2530_v1 }
 0x3d1   :  { %2203 = vmatpush3.msra.mxu1 %v2644_v4 }
 0x3d2   :  { %2204 = vmatprep.subr.mxu1 %v2530_v1 }
 0x3d3   :  { %2205 = vmatpush3.msra.mxu1 %v2652_v5 }
 0x3d4   :  { %2206 = vmatprep.subr.mxu1 %v2530_v1 }
 0x3d5   :  { %2207 = vmatpush3.msra.mxu1 %v2659_v6 }
 0x3d6   :  { %2209 = vmatmul.mubr.msk.f32.vlgmr.msra.gmra.mxu1 %vm104_vm1, %v1970_v57  ;;  %2229 = vmatprep.subr.mxu1 %v2530_v1 }
 0x3d7   :  { %2233 = vmatprep.mubr.msk.f32.mxu1 %vm2531_vm0, %v2530_v1  ;;  %2230 = vmatpush3.msra.mxu1 %v1108_v9 }
 0x3d8   :  { %2231 = vmatprep.subr.mxu1 %v2530_v1 }
 0x3d9   :  { %2232 = vmatpush3.msra.mxu1 %v1107_v11 }
 0x3da   :  { %2236 = vmatprep.subr.mxu1 %v2530_v1 }
 0x48e   :  { %v868_v61 = vpop.f32.mrf.mxu1 }
 0x48f   :  { %v872_v62 = vadd.f32 %v868_v61, %v717_v52  ;;  %v2542_v61 = vmov 683565275  }
 0x490   :  { %v2199_v63 = vpop.f32.mrf.mxu1 }
 0x491   :  { %v2543_v63 = vmov 2475754826  }
 0x496   :  { %v948_v0 = vpop.f32.mrf.mxu1 }
 0x497   :  { %2216 = vmatmul.mubr.msk.f32.vlgmr.msra.gmra.mxu0 %vm261_vm4, %v948_v0 }
 0x498   :  { %2219 = vmatpush3.msra.mxu0 %v2639_v3  ;;  %v2210_v8 = vpop.f32.mrf.mxu1  ;;  %2226 = vmatprep.mubr.msk.f32.mxu0 %vm2531_vm0, %v2530_v1 }
 0x499   :  { %2220 = vmatprep.subr.mxu0 %v2530_v1  ;;  %v2544_v8 = vmov 2131351028  }
 0x49a   :  { %2221 = vmatpush3.msra.mxu0 %v2644_v4 }
 0x49b   :  { %2222 = vmatprep.subr.mxu0 %v2530_v1 }
 0x49c   :  { %2223 = vmatpush3.msra.mxu0 %v2652_v5 }
 0x49d   :  { %2224 = vmatprep.subr.mxu0 %v2530_v1 }
 0x49e   :  { %2225 = vmatpush3.msra.mxu0 %v2659_v6 }
 0x49f   :  { %2227 = vmatmul.mubr.msk.f32.vlgmr.msra.gmra.mxu0 %vm104_vm1, %v1973_v2  ;;  %2247 = vmatprep.subr.mxu0 %v2530_v1 }
 0x4a0   :  { %2251 = vmatprep.mubr.msk.f32.mxu0 %vm2531_vm0, %v2530_v1 }
 0x557   :  { %v1023_v12 = vpop.f32.mrf.mxu0 }
 0x558   :  { %v1027_v13 = vadd.f32 %v1023_v12, %v872_v62 }
 0x559   :  { %v2217_v14 = vpop.f32.mrf.mxu0 }
 0x55f   :  { %v1103_v15 = vpop.f32.mrf.mxu0 }
 0x560   :  { %2234 = vmatmul.mubr.msk.f32.vlgmr.msra.gmra.mxu1 %vm261_vm4, %v1103_v15 }
 0x561   :  { %2237 = vmatpush3.msra.mxu1 %v2639_v3  ;;  %v2228_v17 = vpop.f32.mrf.mxu0  ;;  %2244 = vmatprep.mubr.msk.f32.mxu1 %vm2531_vm0, %v2530_v1  ;;  %v1263_v3 = vld [vmem:[#allocation2 + $0x78] sm:$0xff] }
 0x562   :  { %2238 = vmatprep.subr.mxu1 %v2530_v1  ;;  %2248 = vmatpush3.msra.mxu0 %v1263_v3 }
 0x563   :  { %2239 = vmatpush3.msra.mxu1 %v2644_v4  ;;  %2249 = vmatprep.subr.mxu0 %v2530_v1 }
 0x564   :  { %2240 = vmatprep.subr.mxu1 %v2530_v1  ;;  %2250 = vmatpush3.msra.mxu0 %v1262_v10 }
 0x565   :  { %2241 = vmatpush3.msra.mxu1 %v2652_v5  ;;  %2254 = vmatprep.subr.mxu0 %v2530_v1 }
 0x566   :  { %2242 = vmatprep.subr.mxu1 %v2530_v1 }
 0x567   :  { %2243 = vmatpush3.msra.mxu1 %v2659_v6 }
 0x568   :  { %2245 = vmatmul.mubr.msk.f32.vlgmr.msra.gmra.mxu1 %vm104_vm1, %v1976_v18  ;;  %2289 = vmatprep.subr.mxu1 %v2530_v1 }
 0x569   :  { %2321 = vmatprep.mubr.msk.f32.mxu1 %vm2531_vm0, %v2530_v1 }
 0x620   :  { %v1178_v4 = vpop.f32.mrf.mxu1 }
 0x621   :  { %v1182_v5 = vadd.f32 %v1178_v4, %v1027_v13 }
 0x622   :  { %v2235_v19 = vpop.f32.mrf.mxu1 }
 0x628   :  { %v1258_v20 = vpop.f32.mrf.mxu1 }
 0x629   :  { %2252 = vmatmul.mubr.msk.f32.vlgmr.msra.gmra.mxu0 %vm261_vm4, %v1258_v20 }
 0x62a   :  { %v2246_v6 = vpop.f32.mrf.mxu1  ;;  %2286 = vmatprep.mubr.msk.f32.mxu0 %vm2531_vm0, %v2530_v1  ;;  %2255 = vmatpush3.msra.mxu0 %v1465_v21 }
 0x62b   :  { %2256 = vmatprep.subr.mxu0 %v2530_v1 }
 0x62c   :  { %2257 = vmatpush3.msra.mxu0 %v1464_v22 }
 0x62d   :  { %2258 = vmatprep.subr.mxu0 %v2530_v1 }
 0x62e   :  { %2259 = vmatpush3.msra.mxu0 %v1463_v23 }
 0x62f   :  { %2260 = vmatprep.subr.mxu0 %v2530_v1 }
 0x630   :  { %2261 = vmatpush3.msra.mxu0 %v1462_v24 }
 0x631   :  { %2262 = vmatprep.subr.mxu0 %v2530_v1 }
 0x632   :  { %2263 = vmatpush3.msra.mxu0 %v1461_v25 }
 0x633   :  { %2264 = vmatprep.subr.mxu0 %v2530_v1 }
 0x634   :  { %2265 = vmatpush3.msra.mxu0 %v1460_v26 }
 0x635   :  { %2266 = vmatprep.subr.mxu0 %v2530_v1 }
 0x636   :  { %2267 = vmatpush3.msra.mxu0 %v1459_v27 }
 0x637   :  { %2268 = vmatprep.subr.mxu0 %v2530_v1 }
 0x638   :  { %2269 = vmatpush3.msra.mxu0 %v1458_v28 }
 0x639   :  { %2270 = vmatprep.subr.mxu0 %v2530_v1 }
 0x63a   :  { %2271 = vmatpush3.msra.mxu0 %v1457_v29 }
 0x63b   :  { %2272 = vmatprep.subr.mxu0 %v2530_v1 }
 0x63c   :  { %2273 = vmatpush3.msra.mxu0 %v1456_v30 }
 0x63d   :  { %2274 = vmatprep.subr.mxu0 %v2530_v1 }
 0x63e   :  { %2275 = vmatpush3.msra.mxu0 %v1455_v31 }
 0x63f   :  { %2276 = vmatprep.subr.mxu0 %v2530_v1 }
 0x640   :  { %2277 = vmatpush3.msra.mxu0 %v1454_v32 }
 0x641   :  { %2278 = vmatprep.subr.mxu0 %v2530_v1 }
 0x642   :  { %2279 = vmatpush3.msra.mxu0 %v1453_v33 }
 0x643   :  { %2280 = vmatprep.subr.mxu0 %v2530_v1 }
 0x644   :  { %2281 = vmatpush3.msra.mxu0 %v1452_v34 }
 0x645   :  { %2282 = vmatprep.subr.mxu0 %v2530_v1 }
 0x646   :  { %2283 = vmatpush3.msra.mxu0 %v1451_v35 }
 0x647   :  { %2284 = vmatprep.subr.mxu0 %v2530_v1 }
 0x648   :  { %2285 = vmatpush3.msra.mxu0 %v1450_v36 }
 0x649   :  { %2324 = vmatprep.subr.mxu0 %v2530_v1 }
 0x6e9   :  { %v1333_v37 = vpop.f32.mrf.mxu0 }
 0x6ea   :  { %v1337_v39 = vadd.f32 %v1333_v37, %v1182_v5 }
 0x6eb   :  { %v2253_v40 = vpop.f32.mrf.mxu0 }
 0x6ec   :  { %v2829_v41 = vadd.f32 %v1979_v38, %v1337_v39 }
 0x6ee   :  { %v1349_v42 = vand.u32 2139095040, %v2829_v41  ;;  %v1346_v43 = vand.u32 2147483647, %v2829_v41  ;;  %vm1348_vm3 = vcmp.lt.s32.totalorder %v2829_v41, 0  ;;  %vm1438_vm8 = vweird.f32 %v2829_v41 }
 0x6f0   :  { %v1350_v44 = vshrl.u32 %v1349_v42, 23  ;;  %v1353_v46 = vand.u32 8388607, %v1346_v43  ;;  %vm1347_vm4 = vcmp.le.f32.partialorder %v1346_v43, 0.7853982 }
 0x6f2   :  { %v1980_v45 = vadd.s32 4294967169, %v1350_v44  ;;  %v1354_v49 = vor.u32 8388608, %v1353_v46 }
 0x6f4   :  { %v1356_v47 = vadd.s32 1, %v1980_v45  ;;  %v1394_v57 = vshll.u32 %v1354_v49, 8 }
 0x6f6   :  { %vm1357_vm11 = vcmp.gt.s32.totalorder %v1356_v47, 0 }
 0x6f7   :  { %v1358_v48 = vsel %vm1357_vm11, %v1356_v47, 0 }
 0x6f8   :  { %v1360_v50 = vand.u32 31, %v1358_v48  ;;  %v1359_v51 = vshrl.u32 %v1358_v48, 5 }
 0x6fa   :  { %v1361_v52 = vsub.s32 32, %v1360_v50  ;;  %v1372_v54 = vshll.u32 %v2539_v53, %v1360_v50  ;;  %v1375_v56 = vshll.u32 %v2540_v55, %v1360_v50  ;;  %v1363_v62 = vshll.u32 %v2542_v61, %v1360_v50 }
 0x6fb   :  { %v1366_v7 = vshll.u32 %v2543_v63, %v1360_v50  ;;  %v1369_v9 = vshll.u32 %v2544_v8, %v1360_v50  ;;  %vm1381_vm12 = vcmp.lt.s32.totalorder %v1359_v51, 4  ;;  %vm1378_vm13 = vcmp.lt.s32.totalorder %v1359_v51, 1 }
 0x6fc   :  { %v1373_v58 = vshrl.u32 %v2540_v55, %v1361_v52  ;;  %v1376_v60 = vshrl.u32 %v2541_v59, %v1361_v52  ;;  %v1364_v0 = vshrl.u32 %v2543_v63, %v1361_v52  ;;  %v1367_v2 = vshrl.u32 %v2544_v8, %v1361_v52 }
 0x6fd   :  { %v1370_v11 = vshrl.u32 %v2539_v53, %v1361_v52  ;;  %v1362_v15 = vshrl.u32 %v2542_v61, %v1361_v52  ;;  %vm1379_vm14 = vcmp.lt.s32.totalorder %v1359_v51, 2  ;;  %vm1380_vm15 = vcmp.lt.s32.totalorder %v1359_v51, 3 }
 0x6fe   :  { %v1374_v12 = vor.u32 %v1373_v58, %v1372_v54  ;;  %v1377_v13 = vor.u32 %v1376_v60, %v1375_v56  ;;  %v1365_v14 = vor.u32 %v1364_v0, %v1363_v62  ;;  %v1368_v16 = vor.u32 %v1367_v2, %v1366_v7 }
 0x6ff   :  { %v1371_v17 = vor.u32 %v1370_v11, %v1369_v9 }
 0x700   :  { %v1387_v18 = vsel %vm1381_vm12, %v1374_v12, 920167782  ;;  %v1391_v3 = vsel %vm1381_vm12, %v1377_v13, 1326507024  ;;  %v1386_v4 = vsel %vm1378_vm13, %v1365_v14, %v1368_v16  ;;  %v1382_v20 = vsel %vm1378_vm13, %v1362_v15, %v1365_v14 }
 0x701   :  { %v1383_v10 = vsel %vm1381_vm12, %v1371_v17, 2102212464  ;;  %v1388_v5 = vsel %vm1380_vm15, %v1371_v17, %v1387_v18  ;;  %v1390_v19 = vsel %vm1378_vm13, %v1368_v16, %v1371_v17  ;;  %v1392_v22 = vsel %vm1380_vm15, %v1374_v12, %v1391_v3  ;;  %v1662_v3 = vld [vmem:[#allocation7 + $0x78] sm:$0xff] }
 0x702   :  { %v1384_v6 = vsel %vm1380_vm15, %v1368_v16, %v1383_v10  ;;  %v1389_v21 = vsel %vm1379_vm14, %v1386_v4, %v1388_v5  ;;  %v1393_v23 = vsel %vm1379_vm14, %v1390_v19, %v1392_v22  ;;  %2290 = vmatpush3.msra.mxu1 %v1662_v3  ;;  %v1661_v10 = vld [vmem:[#allocation7 + $0x70] sm:$0xff]  ;;  %v1660_v4 = vld [vmem:[#allocation7 + $0x68] sm:$0xff]  ;;  %v1659_v5 = vld [vmem:[#allocation7 + $0x60] sm:$0xff] }
 0x703   :  { %v2846_v24 = vmul.u32.u64.low %v1394_v57, %v1389_v21  ;;  %v2847_v25 = vmul.u32.u64.high %v1394_v57, %v1389_v21, %v2846_v24  ;;  %v2849_v26 = vmul.u32.u64.low %v1394_v57, %v1393_v23  ;;  %v2850_v27 = vmul.u32.u64.high %v1394_v57, %v1393_v23, %v2849_v26  ;;  %2291 = vmatprep.subr.mxu1 %v2530_v1  ;;  %v1657_v19 = vld [vmem:[#allocation7 + $0x50] sm:$0xff]  ;;  %v1654_v21 = vld [vmem:[#allocation7 + $0x38] sm:$0xff]  ;;  %v1652_v23 = vld [vmem:[#allocation7 + $0x28] sm:$0xff] }
 0x704   :  { %v1385_v28 = vsel %vm1379_vm14, %v1382_v20, %v1384_v6  ;;  %2292 = vmatpush3.msra.mxu1 %v1661_v10  ;;  %v1656_v20 = vld [vmem:[#allocation7 + $0x48] sm:$0xff]  ;;  %v1655_v6 = vld [vmem:[#allocation7 + $0x40] sm:$0xff]  ;;  %v1653_v22 = vld [vmem:[#allocation7 + $0x30] sm:$0xff] }
 0x705   :  { %v1404_v29 = vadd.s32 1, %v2847_v25  ;;  %v1401_v30 = vmul.u32 %v1394_v57, %v1385_v28  ;;  %vm1403_vm1 = vc.u32 %v2850_v27, %v2846_v24  ;;  %v1402_v44 = vadd.s32 %v2846_v24, %v2850_v27  ;;  %2293 = vmatprep.subr.mxu1 %v2530_v1  ;;  %v1651_v24 = vld [vmem:[#allocation7 + $0x20] sm:$0xff]  ;;  %v1649_v26 = vld [vmem:[#allocation7 + $0x10] sm:$0xff]  ;;  %v1648_v27 = vld [vmem:[#allocation7 + $0x8] sm:$0xff] }
 0x706   :  { %2294 = vmatpush3.msra.mxu1 %v1660_v4  ;;  %v1647_v28 = vld [vmem:[#allocation7] sm:$0xff] }
 0x707   :  { %v1405_v31 = vsel %vm1403_vm1, %v1404_v29, %v2847_v25  ;;  %2295 = vmatprep.subr.mxu1 %v2530_v1  ;;  %v1650_v25 = vld [vmem:[#allocation7 + $0x18] sm:$0xff]  ;;  %v1984_v29 = vld [vmem:[%s2974_s5] ss:$0 sm:$0xff] }
 0x708   :  { %v1406_v32 = vadd.s32 %v1405_v31, %v1401_v30  ;;  %2296 = vmatpush3.msra.mxu1 %v1659_v5 }
 0x709   :  { %2297 = vmatprep.subr.mxu1 %v2530_v1 }
 0x70a   :  { %v1407_v33 = vadd.s32 536870912, %v1406_v32 }
 0x70c   :  { %v1408_v34 = vshrl.u32 %v1407_v33, 30 }
 0x70e   :  { %v1409_v35 = vshll.u32 %v1408_v34, 30  ;;  %v1432_v60 = vsub.s32 4, %v1408_v34 }
 0x710   :  { %v1410_v36 = vsub.s32 %v1406_v32, %v1409_v35  ;;  %v1433_v7 = vsel %vm1348_vm3, %v1432_v60, %v1408_v34 }
 0x711   :  { %v1435_v2 = vsel %vm1347_vm4, 0, %v1433_v7 }
 0x712   :  { %v1412_v37 = vsub.s32 0, %v1410_v36  ;;  %v1439_v9 = vadd.s32 3, %v1435_v2 }
 0x714   :  { %v1981_v38 = vmin.u32 %v1412_v37, %v1410_v36  ;;  %v1440_v11 = vand.u32 3, %v1439_v9 }
 0x716   :  { %v1414_v39 = vclz %v1981_v38  ;;  %vm1445_vm5 = vcmp.eq.s32.totalorder %v1440_v11, 2  ;;  %vm1442_vm6 = vcmp.eq.s32.totalorder %v1440_v11, 0  ;;  %vm1441_vm7 = vcmp.lt.s32.totalorder %v1440_v11, 2 }
 0x718   :  { %v1982_v40 = vadd.s32 4294967294, %v1414_v39 }
 0x71a   :  { %vm1983_vm2 = vcmp.lt.s32.totalorder %v1982_v40, 0 }
 0x71b   :  { %v1417_v42 = vsel %vm1983_vm2, 0, %v1982_v40 }
 0x71c   :  { %v1418_v45 = vsub.s32 32, %v1417_v42  ;;  %v1422_v46 = vsub.s32 4294967266, %v1417_v42  ;;  %v1419_v47 = vshll.u32 %v1410_v36, %v1417_v42 }
 0x71e   :  { %v1420_v48 = vshrl.u32 %v1402_v44, %v1418_v45  ;;  %v1423_v49 = vadd.s32 127, %v1422_v46 }
 0x720   :  { %v1421_v50 = vor.u32 %v1420_v48, %v1419_v47  ;;  %v1424_v51 = vshll.u32 %v1423_v49, 23 }
 0x722   :  { %v1425_v52 = vor.u32 4788187, %v1424_v51  ;;  %v1428_v56 = vcvt.s32.f32 %v1421_v50 }
 0x724   :  { %v1426_v54 = vand.u32 2147483647, %v1425_v52 }
 0x726   :  { %v1429_v57 = vmul.f32 %v1428_v56, %v1426_v54 }
 0x728   :  { %v1430_v58 = vxor.u32 2147483648, %v1429_v57 }
 0x72a   :  { %v1431_v62 = vsel %vm1348_vm3, %v1430_v58, %v1429_v57 }
 0x72b   :  { %v1434_v0 = vsel %vm1347_vm4, %v2829_v41, %v1431_v62  ;;  %v1658_v41 = vld [vmem:[#allocation7 + $0x58] sm:$0xff] }
 0x72c   :  { %2403 = vcosq.f32 %v1434_v0  ;;  %2298 = vmatpush3.msra.mxu1 %v1658_v41 }
 0x72d   :  { %2405 = vsinq.f32 %v1434_v0  ;;  %2299 = vmatprep.subr.mxu1 %v2530_v1 }
 0x72e   :  { %2300 = vmatpush3.msra.mxu1 %v1657_v19 }
 0x72f   :  { %2301 = vmatprep.subr.mxu1 %v2530_v1 }
 0x730   :  { %2302 = vmatpush3.msra.mxu1 %v1656_v20 }
 0x731   :  { %2303 = vmatprep.subr.mxu1 %v2530_v1 }
 0x732   :  { %2304 = vmatpush3.msra.mxu1 %v1655_v6 }
 0x733   :  { %2305 = vmatprep.subr.mxu1 %v2530_v1 }
 0x734   :  { %2306 = vmatpush3.msra.mxu1 %v1654_v21 }
 0x735   :  { %2307 = vmatprep.subr.mxu1 %v2530_v1 }
 0x736   :  { %2308 = vmatpush3.msra.mxu1 %v1653_v22 }
 0x737   :  { %2309 = vmatprep.subr.mxu1 %v2530_v1 }
 0x738   :  { %2310 = vmatpush3.msra.mxu1 %v1652_v23 }
 0x739   :  { %v2404_v12 = vpop.eup %2403  ;;  %2311 = vmatprep.subr.mxu1 %v2530_v1 }
 0x73a   :  { %v2406_v13 = vpop.eup %2405  ;;  %v1446_v14 = vxor.u32 2147483648, %v2404_v12  ;;  %2312 = vmatpush3.msra.mxu1 %v1651_v24 }
 0x73b   :  { %v1443_v15 = vxor.u32 2147483648, %v2406_v13  ;;  %2313 = vmatprep.subr.mxu1 %v2530_v1 }
 0x73c   :  { %v1447_v16 = vsel %vm1445_vm5, %v1446_v14, %v2406_v13  ;;  %2314 = vmatpush3.msra.mxu1 %v1650_v25 }
 0x73d   :  { %v1444_v17 = vsel %vm1442_vm6, %v2404_v12, %v1443_v15  ;;  %2315 = vmatprep.subr.mxu1 %v2530_v1 }
 0x73e   :  { %v1448_v43 = vsel %vm1441_vm7, %v1444_v17, %v1447_v16  ;;  %2316 = vmatpush3.msra.mxu1 %v1649_v26 }
 0x73f   :  { %v1449_v18 = vsel %vm1438_vm8, nan, %v1448_v43  ;;  %2317 = vmatprep.subr.mxu1 %v2530_v1 }
 0x740   :  { %2287 = vmatmul.mubr.f32.vlgmr.msra.gmra.mxu0 %v1449_v18  ;;  %2318 = vmatpush3.msra.mxu1 %v1648_v27 }
 0x741   :  { %2356 = vmatprep.mubr.msk.f32.mxu0 %vm2531_vm0, %v2530_v1  ;;  %2319 = vmatprep.subr.mxu1 %v2530_v1 }
 0x742   :  { %2320 = vmatpush3.msra.mxu1 %v1647_v28 }
 0x800   :  { %v1539_v30 = vpop.f32.mrf.mxu0 }
 0x801   :  { %v2881_v31 = vadd.f32 %v1984_v29, %v1539_v30 }
 0x802   :  { %v2288_v32 = vpop.f32.mrf.mxu0 }
 0x803   :  { %v1546_v33 = vand.u32 2139095040, %v2881_v31  ;;  %v1543_v37 = vand.u32 2147483647, %v2881_v31  ;;  %vm1545_vm15 = vcmp.lt.s32.totalorder %v2881_v31, 0  ;;  %vm1635_vm5 = vweird.f32 %v2881_v31 }
 0x805   :  { %v1547_v34 = vshrl.u32 %v1546_v33, 23  ;;  %v1550_v40 = vand.u32 8388607, %v1543_v37  ;;  %vm1544_vm1 = vcmp.le.f32.partialorder %v1543_v37, 0.7853982 }
 0x807   :  { %v1985_v35 = vadd.s32 4294967169, %v1547_v34  ;;  %v1551_v57 = vor.u32 8388608, %v1550_v40 }
 0x809   :  { %v1553_v36 = vadd.s32 1, %v1985_v35  ;;  %v1591_v17 = vshll.u32 %v1551_v57, 8 }
 0x80b   :  { %vm1554_vm0 = vcmp.gt.s32.totalorder %v1553_v36, 0 }
 0x80c   :  { %v1555_v38 = vsel %vm1554_vm0, %v1553_v36, 0 }
 0x80d   :  { %v1557_v39 = vand.u32 31, %v1555_v38  ;;  %v1556_v44 = vshrl.u32 %v1555_v38, 5 }
 0x80f   :  { %v1558_v42 = vsub.s32 32, %v1557_v39  ;;  %v1560_v45 = vshll.u32 %v2542_v61, %v1557_v39  ;;  %v1563_v46 = vshll.u32 %v2543_v63, %v1557_v39  ;;  %v1566_v49 = vshll.u32 %v2544_v8, %v1557_v39 }
 0x810   :  { %v1569_v51 = vshll.u32 %v2539_v53, %v1557_v39  ;;  %v1572_v54 = vshll.u32 %v2540_v55, %v1557_v39  ;;  %vm1575_vm9 = vcmp.lt.s32.totalorder %v1556_v44, 1  ;;  %vm1578_vm10 = vcmp.lt.s32.totalorder %v1556_v44, 4 }
 0x811   :  { %v1561_v47 = vshrl.u32 %v2543_v63, %v1558_v42  ;;  %v1564_v48 = vshrl.u32 %v2544_v8, %v1558_v42  ;;  %v1567_v50 = vshrl.u32 %v2539_v53, %v1558_v42  ;;  %v1570_v52 = vshrl.u32 %v2540_v55, %v1558_v42 }
 0x812   :  { %v1573_v56 = vshrl.u32 %v2541_v59, %v1558_v42  ;;  %v1559_v12 = vshrl.u32 %v2542_v61, %v1558_v42  ;;  %vm1577_vm11 = vcmp.lt.s32.totalorder %v1556_v44, 3  ;;  %vm1576_vm12 = vcmp.lt.s32.totalorder %v1556_v44, 2 }
 0x813   :  { %v1562_v58 = vor.u32 %v1561_v47, %v1560_v45  ;;  %v1565_v60 = vor.u32 %v1564_v48, %v1563_v46  ;;  %v1568_v62 = vor.u32 %v1567_v50, %v1566_v49  ;;  %v1571_v0 = vor.u32 %v1570_v52, %v1569_v51 }
 0x814   :  { %v1574_v7 = vor.u32 %v1573_v56, %v1572_v54 }
 0x815   :  { %v1580_v2 = vsel %vm1578_vm10, %v1568_v62, 2102212464  ;;  %v1583_v9 = vsel %vm1575_vm9, %v1562_v58, %v1565_v60  ;;  %v1587_v11 = vsel %vm1575_vm9, %v1565_v60, %v1568_v62  ;;  %v1584_v13 = vsel %vm1578_vm10, %v1571_v0, 920167782 }
 0x816   :  { %v1588_v14 = vsel %vm1578_vm10, %v1574_v7, 1326507024  ;;  %v1585_v15 = vsel %vm1577_vm11, %v1568_v62, %v1584_v13  ;;  %v1579_v43 = vsel %vm1575_vm9, %v1559_v12, %v1562_v58  ;;  %v1581_v18 = vsel %vm1577_vm11, %v1565_v60, %v1580_v2  ;;  %v1859_v12 = vld [vmem:[#allocation8 + $0x78] sm:$0xff]  ;;  %v1858_v13 = vld [vmem:[#allocation8 + $0x70] sm:$0xff] }
 0x817   :  { %v1589_v16 = vsel %vm1577_vm11, %v1571_v0, %v1588_v14  ;;  %v1586_v3 = vsel %vm1576_vm12, %v1583_v9, %v1585_v15  ;;  %v1582_v20 = vsel %vm1576_vm12, %v1579_v43, %v1581_v18  ;;  %2325 = vmatpush3.msra.mxu0 %v1859_v12  ;;  %v1857_v14 = vld [vmem:[#allocation8 + $0x68] sm:$0xff]  ;;  %v1856_v15 = vld [vmem:[#allocation8 + $0x60] sm:$0xff]  ;;  %v1851_v18 = vld [vmem:[#allocation8 + $0x38] sm:$0xff] }
 0x818   :  { %v1590_v10 = vsel %vm1576_vm12, %v1587_v11, %v1589_v16  ;;  %v2901_v41 = vmul.u32.u64.low %v1591_v17, %v1586_v3  ;;  %v2902_v19 = vmul.u32.u64.high %v1591_v17, %v1586_v3, %v2901_v41  ;;  %v1598_v21 = vmul.u32 %v1591_v17, %v1582_v20  ;;  %2326 = vmatprep.subr.mxu0 %v2530_v1  ;;  %v1854_v16 = vld [vmem:[#allocation8 + $0x50] sm:$0xff]  ;;  %v1852_v43 = vld [vmem:[#allocation8 + $0x40] sm:$0xff] }
 0x819   :  { %v2898_v4 = vmul.u32.u64.low %v1591_v17, %v1590_v10  ;;  %v2899_v5 = vmul.u32.u64.high %v1591_v17, %v1590_v10, %v2898_v4  ;;  %2327 = vmatpush3.msra.mxu0 %v1858_v13  ;;  %v1853_v17 = vld [vmem:[#allocation8 + $0x48] sm:$0xff]  ;;  %v1850_v3 = vld [vmem:[#allocation8 + $0x30] sm:$0xff]  ;;  %v1844_v20 = vld [vmem:[#allocation8] sm:$0xff] }
 0x81a   :  { %v1601_v6 = vadd.s32 1, %v2902_v19  ;;  %2328 = vmatprep.subr.mxu0 %v2530_v1  ;;  %v1849_v10 = vld [vmem:[#allocation8 + $0x28] sm:$0xff]  ;;  %v1848_v4 = vld [vmem:[#allocation8 + $0x20] sm:$0xff] }
 0x81b   :  { %vm1600_vm13 = vc.u32 %v2899_v5, %v2901_v41  ;;  %v1599_v34 = vadd.s32 %v2901_v41, %v2899_v5  ;;  %2329 = vmatpush3.msra.mxu0 %v1857_v14  ;;  %v1847_v5 = vld [vmem:[#allocation8 + $0x18] sm:$0xff]  ;;  %v1846_v41 = vld [vmem:[#allocation8 + $0x10] sm:$0xff] }
 0x81c   :  { %v1602_v22 = vsel %vm1600_vm13, %v1601_v6, %v2902_v19  ;;  %2330 = vmatprep.subr.mxu0 %v2530_v1  ;;  %v1845_v19 = vld [vmem:[#allocation8 + $0x8] sm:$0xff]  ;;  %v1989_v6 = vld [vmem:[%s2976_s7] ss:$0 sm:$0xff] }
 0x81d   :  { %v1603_v23 = vadd.s32 %v1602_v22, %v1598_v21  ;;  %2331 = vmatpush3.msra.mxu0 %v1856_v15 }
 0x81e   :  { %2332 = vmatprep.subr.mxu0 %v2530_v1 }
 0x81f   :  { %v1604_v24 = vadd.s32 536870912, %v1603_v23 }
 0x821   :  { %v1605_v25 = vshrl.u32 %v1604_v24, 30 }
 0x823   :  { %v1606_v26 = vshll.u32 %v1605_v25, 30  ;;  %v1629_v50 = vsub.s32 4, %v1605_v25 }
 0x825   :  { %v1607_v27 = vsub.s32 %v1603_v23, %v1606_v26  ;;  %v1630_v54 = vsel %vm1545_vm15, %v1629_v50, %v1605_v25 }
 0x826   :  { %v1632_v56 = vsel %vm1544_vm1, 0, %v1630_v54 }
 0x827   :  { %v1609_v28 = vsub.s32 0, %v1607_v27  ;;  %v1636_v57 = vadd.s32 3, %v1632_v56 }
 0x829   :  { %v1986_v29 = vmin.u32 %v1609_v28, %v1607_v27  ;;  %v1637_v58 = vand.u32 3, %v1636_v57 }
 0x82b   :  { %v1611_v30 = vclz %v1986_v29  ;;  %vm1642_vm2 = vcmp.eq.s32.totalorder %v1637_v58, 2  ;;  %vm1639_vm3 = vcmp.eq.s32.totalorder %v1637_v58, 0  ;;  %vm1638_vm4 = vcmp.lt.s32.totalorder %v1637_v58, 2 }
 0x82d   :  { %v1987_v32 = vadd.s32 4294967294, %v1611_v30 }
 0x82f   :  { %vm1988_vm14 = vcmp.lt.s32.totalorder %v1987_v32, 0 }
 0x830   :  { %v1614_v33 = vsel %vm1988_vm14, 0, %v1987_v32 }
 0x831   :  { %v1615_v35 = vsub.s32 32, %v1614_v33  ;;  %v1619_v36 = vsub.s32 4294967266, %v1614_v33  ;;  %v1616_v38 = vshll.u32 %v1607_v27, %v1614_v33 }
 0x833   :  { %v1617_v39 = vshrl.u32 %v1599_v34, %v1615_v35  ;;  %v1620_v40 = vadd.s32 127, %v1619_v36 }
 0x835   :  { %v1618_v42 = vor.u32 %v1617_v39, %v1616_v38  ;;  %v1621_v44 = vshll.u32 %v1620_v40, 23 }
 0x837   :  { %v1622_v45 = vor.u32 4788187, %v1621_v44  ;;  %v1625_v47 = vcvt.s32.f32 %v1618_v42 }
 0x839   :  { %v1623_v46 = vand.u32 2147483647, %v1622_v45 }
 0x83b   :  { %v1626_v48 = vmul.f32 %v1625_v47, %v1623_v46 }
 0x83d   :  { %v1627_v49 = vxor.u32 2147483648, %v1626_v48 }
 0x83f   :  { %v1628_v51 = vsel %vm1545_vm15, %v1627_v49, %v1626_v48 }
 0x840   :  { %v1631_v52 = vsel %vm1544_vm1, %v2881_v31, %v1628_v51  ;;  %v1855_v31 = vld [vmem:[#allocation8 + $0x58] sm:$0xff] }
 0x841   :  { %2407 = vcosq.f32 %v1631_v52  ;;  %2333 = vmatpush3.msra.mxu0 %v1855_v31 }
 0x842   :  { %2409 = vsinq.f32 %v1631_v52  ;;  %2334 = vmatprep.subr.mxu0 %v2530_v1 }
 0x843   :  { %2335 = vmatpush3.msra.mxu0 %v1854_v16 }
 0x844   :  { %2336 = vmatprep.subr.mxu0 %v2530_v1 }
 0x845   :  { %2337 = vmatpush3.msra.mxu0 %v1853_v17 }
 0x846   :  { %2338 = vmatprep.subr.mxu0 %v2530_v1 }
 0x847   :  { %2339 = vmatpush3.msra.mxu0 %v1852_v43 }
 0x848   :  { %2340 = vmatprep.subr.mxu0 %v2530_v1 }
 0x849   :  { %2341 = vmatpush3.msra.mxu0 %v1851_v18 }
 0x84a   :  { %2342 = vmatprep.subr.mxu0 %v2530_v1 }
 0x84b   :  { %2343 = vmatpush3.msra.mxu0 %v1850_v3 }
 0x84c   :  { %2344 = vmatprep.subr.mxu0 %v2530_v1 }
 0x84d   :  { %2345 = vmatpush3.msra.mxu0 %v1849_v10 }
 0x84e   :  { %v2408_v60 = vpop.eup %2407  ;;  %2346 = vmatprep.subr.mxu0 %v2530_v1 }
 0x84f   :  { %v2410_v62 = vpop.eup %2409  ;;  %v1643_v0 = vxor.u32 2147483648, %v2408_v60  ;;  %2347 = vmatpush3.msra.mxu0 %v1848_v4 }
 0x850   :  { %v1640_v7 = vxor.u32 2147483648, %v2410_v62  ;;  %2348 = vmatprep.subr.mxu0 %v2530_v1 }
 0x851   :  { %v1644_v2 = vsel %vm1642_vm2, %v1643_v0, %v2410_v62  ;;  %2349 = vmatpush3.msra.mxu0 %v1847_v5 }
 0x852   :  { %v1641_v9 = vsel %vm1639_vm3, %v2408_v60, %v1640_v7  ;;  %2350 = vmatprep.subr.mxu0 %v2530_v1 }
 0x853   :  { %v1645_v37 = vsel %vm1638_vm4, %v1641_v9, %v1644_v2  ;;  %2351 = vmatpush3.msra.mxu0 %v1846_v41 }
 0x854   :  { %v1646_v11 = vsel %vm1635_vm5, nan, %v1645_v37  ;;  %2352 = vmatprep.subr.mxu0 %v2530_v1 }
 0x855   :  { %2322 = vmatmul.mubr.f32.vlgmr.msra.gmra.mxu1 %v1646_v11  ;;  %2353 = vmatpush3.msra.mxu0 %v1845_v19 }
 0x856   :  { %2354 = vmatprep.subr.mxu0 %v2530_v1 }
 0x857   :  { %2355 = vmatpush3.msra.mxu0 %v1844_v20 }
 0x915   :  { %v1736_v21 = vpop.f32.mrf.mxu1 }
 0x916   :  { %v2931_v22 = vadd.f32 %v1989_v6, %v1736_v21 }
 0x917   :  { %v2323_v23 = vpop.f32.mrf.mxu1 }
 0x918   :  { %v1743_v24 = vand.u32 2139095040, %v2931_v22  ;;  %v1740_v28 = vand.u32 2147483647, %v2931_v22  ;;  %vm1742_vm12 = vcmp.lt.s32.totalorder %v2931_v22, 0  ;;  %vm1832_vm2 = vweird.f32 %v2931_v22 }
 0x91a   :  { %v1744_v25 = vshrl.u32 %v1743_v24, 23  ;;  %v1747_v1 = vand.u32 8388607, %v1740_v28  ;;  %vm1741_vm13 = vcmp.le.f32.partialorder %v1740_v28, 0.7853982 }
 0x91c   :  { %v1990_v26 = vadd.s32 4294967169, %v1744_v25  ;;  %v1748_v47 = vor.u32 8388608, %v1747_v1 }
 0x91e   :  { %v1750_v27 = vadd.s32 1, %v1990_v26 }
 0x920   :  { %vm1751_vm6 = vcmp.gt.s32.totalorder %v1750_v27, 0 }
 0x921   :  { %v1752_v29 = vsel %vm1751_vm6, %v1750_v27, 0 }
 0x922   :  { %v1754_v30 = vand.u32 31, %v1752_v29  ;;  %v1753_v33 = vshrl.u32 %v1752_v29, 5 }
 0x924   :  { %v1755_v32 = vsub.s32 32, %v1754_v30  ;;  %v1757_v34 = vshll.u32 %v2542_v61, %v1754_v30  ;;  %v1760_v35 = vshll.u32 %v2543_v63, %v1754_v30  ;;  %v1763_v39 = vshll.u32 %v2544_v8, %v1754_v30 }
 0x925   :  { %v1766_v42 = vshll.u32 %v2539_v53, %v1754_v30  ;;  %v1769_v45 = vshll.u32 %v2540_v55, %v1754_v30  ;;  %vm1772_vm7 = vcmp.lt.s32.totalorder %v1753_v33, 1  ;;  %vm1775_vm8 = vcmp.lt.s32.totalorder %v1753_v33, 4 }
 0x926   :  { %v1758_v36 = vshrl.u32 %v2543_v63, %v1755_v32  ;;  %v1761_v38 = vshrl.u32 %v2544_v8, %v1755_v32  ;;  %v1764_v40 = vshrl.u32 %v2539_v53, %v1755_v32  ;;  %v1767_v44 = vshrl.u32 %v2540_v55, %v1755_v32 }
 0x927   :  { %v1770_v46 = vshrl.u32 %v2541_v59, %v1755_v32  ;;  %v1756_v56 = vshrl.u32 %v2542_v61, %v1755_v32  ;;  %vm1774_vm0 = vcmp.lt.s32.totalorder %v1753_v33, 3  ;;  %vm1773_vm9 = vcmp.lt.s32.totalorder %v1753_v33, 2 }
 0x928   :  { %v1759_v48 = vor.u32 %v1758_v36, %v1757_v34  ;;  %v1762_v49 = vor.u32 %v1761_v38, %v1760_v35  ;;  %v1765_v50 = vor.u32 %v1764_v40, %v1763_v39  ;;  %v1768_v51 = vor.u32 %v1767_v44, %v1766_v42 }
 0x929   :  { %v1771_v63 = vor.u32 %v1770_v46, %v1769_v45  ;;  %v1788_v59 = vshll.u32 %v1748_v47, 8 }
 0x92a   :  { %v1777_v52 = vsel %vm1775_vm8, %v1765_v50, 2102212464  ;;  %v1780_v8 = vsel %vm1772_vm7, %v1759_v48, %v1762_v49  ;;  %v1784_v54 = vsel %vm1772_vm7, %v1762_v49, %v1765_v50  ;;  %v1781_v53 = vsel %vm1775_vm8, %v1768_v51, 920167782 }
 0x92b   :  { %v1785_v57 = vsel %vm1775_vm8, %v1771_v63, 1326507024  ;;  %v1782_v55 = vsel %vm1774_vm0, %v1765_v50, %v1781_v53  ;;  %v1776_v60 = vsel %vm1772_vm7, %v1756_v56, %v1759_v48  ;;  %v1778_v62 = vsel %vm1774_vm0, %v1762_v49, %v1777_v52  ;;  %v1994_v49 = vld [vmem:[%s2978_s9] ss:$0 sm:$0xff] }
 0x92c   :  { %v1786_v58 = vsel %vm1774_vm0, %v1768_v51, %v1785_v57  ;;  %v1783_v0 = vsel %vm1773_vm9, %v1780_v8, %v1782_v55  ;;  %v1779_v12 = vsel %vm1773_vm9, %v1776_v60, %v1778_v62 }
 0x92d   :  { %v1787_v7 = vsel %vm1773_vm9, %v1784_v54, %v1786_v58  ;;  %v2951_v37 = vmul.u32.u64.low %v1788_v59, %v1783_v0  ;;  %v2952_v11 = vmul.u32.u64.high %v1788_v59, %v1783_v0, %v2951_v37  ;;  %v1795_v13 = vmul.u32 %v1788_v59, %v1779_v12 }
 0x92e   :  { %v2948_v2 = vmul.u32.u64.low %v1788_v59, %v1787_v7  ;;  %v2949_v9 = vmul.u32.u64.high %v1788_v59, %v1787_v7, %v2948_v2 }
 0x92f   :  { %v1798_v61 = vadd.s32 1, %v2952_v11 }
 0x930   :  { %vm1797_vm10 = vc.u32 %v2949_v9, %v2951_v37  ;;  %v1796_v41 = vadd.s32 %v2951_v37, %v2949_v9 }
 0x931   :  { %v1799_v14 = vsel %vm1797_vm10, %v1798_v61, %v2952_v11 }
 0x932   :  { %v1800_v15 = vadd.s32 %v1799_v14, %v1795_v13 }
 0x934   :  { %v1801_v31 = vadd.s32 536870912, %v1800_v15 }
 0x936   :  { %v1802_v16 = vshrl.u32 %v1801_v31, 30 }
 0x938   :  { %v1803_v17 = vshll.u32 %v1802_v16, 30  ;;  %v1826_v32 = vsub.s32 4, %v1802_v16 }
 0x93a   :  { %v1804_v43 = vsub.s32 %v1800_v15, %v1803_v17  ;;  %v1827_v35 = vsel %vm1742_vm12, %v1826_v32, %v1802_v16 }
 0x93b   :  { %v1829_v36 = vsel %vm1741_vm13, 0, %v1827_v35 }
 0x93c   :  { %v1806_v18 = vsub.s32 0, %v1804_v43  ;;  %v1833_v38 = vadd.s32 3, %v1829_v36 }
 0x93e   :  { %v1991_v3 = vmin.u32 %v1806_v18, %v1804_v43  ;;  %v1834_v39 = vand.u32 3, %v1833_v38 }
 0x940   :  { %v1808_v10 = vclz %v1991_v3  ;;  %vm1839_vm14 = vcmp.eq.s32.totalorder %v1834_v39, 2  ;;  %vm1836_vm15 = vcmp.eq.s32.totalorder %v1834_v39, 0  ;;  %vm1835_vm1 = vcmp.lt.s32.totalorder %v1834_v39, 2 }
 0x942   :  { %v1992_v4 = vadd.s32 4294967294, %v1808_v10 }
 0x944   :  { %vm1993_vm11 = vcmp.lt.s32.totalorder %v1992_v4, 0 }
 0x945   :  { %v1811_v5 = vsel %vm1993_vm11, 0, %v1992_v4 }
 0x946   :  { %v1812_v19 = vsub.s32 32, %v1811_v5  ;;  %v1816_v20 = vsub.s32 4294967266, %v1811_v5  ;;  %v1813_v6 = vshll.u32 %v1804_v43, %v1811_v5 }
 0x948   :  { %v1814_v21 = vshrl.u32 %v1796_v41, %v1812_v19  ;;  %v1817_v23 = vadd.s32 127, %v1816_v20 }
 0x94a   :  { %v1815_v24 = vor.u32 %v1814_v21, %v1813_v6  ;;  %v1818_v25 = vshll.u32 %v1817_v23, 23 }
 0x94c   :  { %v1819_v26 = vor.u32 4788187, %v1818_v25  ;;  %v1822_v29 = vcvt.s32.f32 %v1815_v24 }
 0x94e   :  { %v1820_v27 = vand.u32 2147483647, %v1819_v26 }
 0x950   :  { %v1823_v30 = vmul.f32 %v1822_v29, %v1820_v27 }
 0x952   :  { %v1824_v1 = vxor.u32 2147483648, %v1823_v30 }
 0x954   :  { %v1825_v33 = vsel %vm1742_vm12, %v1824_v1, %v1823_v30 }
 0x955   :  { %v1828_v34 = vsel %vm1741_vm13, %v2931_v22, %v1825_v33 }
 0x956   :  { %2411 = vcosq.f32 %v1828_v34 }
 0x957   :  { %2413 = vsinq.f32 %v1828_v34 }
 0x963   :  { %v2412_v40 = vpop.eup %2411 }
 0x964   :  { %v2414_v42 = vpop.eup %2413  ;;  %v1840_v44 = vxor.u32 2147483648, %v2412_v40 }
 0x965   :  { %v1837_v45 = vxor.u32 2147483648, %v2414_v42 }
 0x966   :  { %v1841_v46 = vsel %vm1839_vm14, %v1840_v44, %v2414_v42 }
 0x967   :  { %v1838_v47 = vsel %vm1836_vm15, %v2412_v40, %v1837_v45 }
 0x968   :  { %v1842_v28 = vsel %vm1835_vm1, %v1838_v47, %v1841_v46 }
 0x969   :  { %v1843_v48 = vsel %vm1832_vm2, nan, %v1842_v28 }
 0x96a   :  { %2357 = vmatmul.mubr.f32.vlgmr.msra.gmra.mxu0 %v1843_v48 }
 0xa2a   :  { %v1933_v50 = vpop.f32.mrf.mxu0 }
 0xa2b   :  { %v1934_v51 = vadd.f32 %v1994_v49, %v1933_v50 }
 0xa2c   :  { %v2358_v63 = vpop.f32.mrf.mxu0 }
 0xa2d   :  { %1937 = vst [vmem:[#allocation10] sm:$0xff] %v1934_v51 }
 0xa2e   :  { %2506 = shalt.err (!%p2503_p10)
}
 0xa2f   :  { %1947 = dma.vmem_to_hbm [thread:$0]  %s1945_s25, 128, %s2979_s10, [#allocation4]  }
 0xa30   :  { %2521 = dma.done.wait [#allocation4], 128  }
 0xa31   :  { %2522 = vsyncadd [#allocation4], 4294967168 }
 0xa32   :  { %1951 = vsyncpa [#allocation3], 1 }
 0xa33   :  { %1952 = vsyncpa [#allocation6], 1 }
 0xa34   :  { %1953 = vsyncpa [#allocation9], 1 }
 0xa35   :  { %1954 = vsyncpa [#allocation4], 1 }

</bundles_post_ra>
